<compile_context>
chip_gen: v6e
topology: v6e:2x2x1
jax: 0.10.0
libtpu: 0.0.40
codegen_flags: <defaults>
</compile_context>

<pallas_src>
import jax
import jax.numpy as jnp
from jax.experimental import pallas as pl
from jax.experimental.pallas import tpu as pltpu


FC1_DIMS = 1024
FC2_DIMS = 512
LANE = 128


def _round_up(x, m):
    return -(-x // m) * m


def qnet_kernel(x_ref, w1_ref, b1_ref, w2_ref, b2_ref, w3_ref, b3_ref, out_ref):
    # fc1 + relu  (bf16 x bf16 -> f32 accumulate on the MXU)
    x = x_ref[...].astype(jnp.bfloat16)
    h1 = jnp.dot(x, w1_ref[...], preferred_element_type=jnp.float32)
    h1 = jnp.maximum(h1 + b1_ref[...], 0.0)
    # fc2 + relu
    h2 = jnp.dot(h1.astype(jnp.bfloat16), w2_ref[...],
                 preferred_element_type=jnp.float32)
    h2 = jnp.maximum(h2 + b2_ref[...], 0.0)
    # q_vals head (no activation), lane-dense padded N
    q = jnp.dot(h2.astype(jnp.bfloat16), w3_ref[...],
                preferred_element_type=jnp.float32)
    out_ref[...] = (q + b3_ref[...]).astype(out_ref.dtype)


def qnet_forward(x, params, num_actions, *, batch_tile=128):
    """x: (B, input_dims) float32. Returns (B, num_actions) float32 Q-values."""
    w1, b1 = params["w1"], params["b1"]
    w2, b2 = params["w2"], params["b2"]
    w3, b3 = params["w3"], params["b3"]

    B, din = x.shape
    a_pad = w3.shape[1]          # lane-dense padded action dim (multiple of 128)

    # Pad batch to a sublane multiple of 8 and pick a batch tile.
    b_pad = max(8, _round_up(B, 8))
    tile_b = min(batch_tile, b_pad)
    b_pad = _round_up(b_pad, tile_b)
    if b_pad != B:
        x = jnp.pad(x, ((0, b_pad - B), (0, 0)))

    grid = (b_pad // tile_b,)

    flops = 2 * b_pad * (din * w1.shape[1]
                         + w1.shape[1] * w2.shape[1]
                         + w2.shape[1] * a_pad)
    bytes_accessed = (
        x.size * x.dtype.itemsize
        + sum(int(p.size) * p.dtype.itemsize for p in (w1, b1, w2, b2, w3, b3))
        + b_pad * a_pad * 4
    )
    cost = pl.CostEstimate(flops=flops, transcendentals=0,
                           bytes_accessed=bytes_accessed)

    out = pl.pallas_call(
        qnet_kernel,
        out_shape=jax.ShapeDtypeStruct((b_pad, a_pad), jnp.float32),
        grid=grid,
        in_specs=[
            pl.BlockSpec((tile_b, din), lambda i: (i, 0)),   # x: tiled over batch
            pl.BlockSpec(w1.shape, lambda i: (0, 0)),        # weights: VMEM-resident
            pl.BlockSpec(b1.shape, lambda i: (0, 0)),
            pl.BlockSpec(w2.shape, lambda i: (0, 0)),
            pl.BlockSpec(b2.shape, lambda i: (0, 0)),
            pl.BlockSpec(w3.shape, lambda i: (0, 0)),
            pl.BlockSpec(b3.shape, lambda i: (0, 0)),
        ],
        out_specs=pl.BlockSpec((tile_b, a_pad), lambda i: (i, 0)),
        compiler_params=pltpu.CompilerParams(
            dimension_semantics=("parallel",),
            vmem_limit_bytes=16 << 20,
        ),
        cost_estimate=cost,
    )(x, w1, b1, w2, b2, w3, b3)

    return out[:B, :num_actions]


def init_qnet_params(key, input_dims, num_actions,
                     fc1_dims=FC1_DIMS, fc2_dims=FC2_DIMS):
    """Deterministic init mimicking nn.Linear default (uniform +/- 1/sqrt(fan_in)).

    Weights are stored transposed relative to PyTorch, shape (in, out), in
    bfloat16 (perf: halves weight HBM traffic; f32 accumulation keeps quality).
    Biases are stored as (1, out) float32. The q_vals head is zero-padded to a
    lane-dense multiple of 128 output columns.
    """
    ks = jax.random.split(key, 6)

    def linear(kw, kb, fan_in, fan_out, pad_out=None):
        bound = 1.0 / jnp.sqrt(jnp.float32(fan_in))
        w = jax.random.uniform(kw, (fan_in, fan_out), jnp.float32, -bound, bound)
        b = jax.random.uniform(kb, (1, fan_out), jnp.float32, -bound, bound)
        if pad_out is not None and pad_out > fan_out:
            w = jnp.pad(w, ((0, 0), (0, pad_out - fan_out)))
            b = jnp.pad(b, ((0, 0), (0, pad_out - fan_out)))
        return w.astype(jnp.bfloat16), b

    a_pad = _round_up(max(num_actions, 1), LANE)
    w1, b1 = linear(ks[0], ks[1], input_dims, fc1_dims)
    w2, b2 = linear(ks[2], ks[3], fc1_dims, fc2_dims)
    w3, b3 = linear(ks[4], ks[5], fc2_dims, num_actions, pad_out=a_pad)
    return {"w1": w1, "b1": b1, "w2": w2, "b2": b2, "w3": w3, "b3": b3}


def qnet_reference(x, params, num_actions):
    """Same mixed precision as the kernel (bf16 matmul inputs, f32 accumulate)."""
    bf = jnp.bfloat16
    h1 = jnp.dot(x.astype(bf), params["w1"], preferred_element_type=jnp.float32)
    h1 = jnp.maximum(h1 + params["b1"], 0.0)
    h2 = jnp.dot(h1.astype(bf), params["w2"], preferred_element_type=jnp.float32)
    h2 = jnp.maximum(h2 + params["b2"], 0.0)
    q = jnp.dot(h2.astype(bf), params["w3"], preferred_element_type=jnp.float32)
    q = q + params["b3"]
    return q[:, :num_actions]


if __name__ == "__main__":
    key = jax.random.PRNGKey(0)
    k_param, k_x = jax.random.split(key)

    batch = 8          # small batch (sublane-friendly)
    input_dims = 32    # e.g. flattened observation vector
    num_actions = 8

    params = init_qnet_params(k_param, input_dims, num_actions)
    x = jax.random.normal(k_x, (batch, input_dims), jnp.float32)

    q_kernel = qnet_forward(x, params, num_actions)
    jax.block_until_ready(q_kernel)

    q_ref = qnet_reference(x, params, num_actions)
    assert q_kernel.shape == (batch, num_actions)
    assert jnp.allclose(q_kernel, q_ref, atol=1e-2, rtol=1e-2), (
        float(jnp.max(jnp.abs(q_kernel - q_ref))))

    print("KERNEL_OK")
</pallas_src>

<mosaic_0001>
module attributes {stable_mosaic.version = 11 : i64} {
  func.func @qnet_kernel(%arg0: i32, %arg1: memref<8x32xf32, #tpu.memory_space<vmem>>, %arg2: memref<32x1024xbf16, #tpu.memory_space<vmem>>, %arg3: memref<1x1024xf32, #tpu.memory_space<vmem>>, %arg4: memref<1024x512xbf16, #tpu.memory_space<vmem>>, %arg5: memref<1x512xf32, #tpu.memory_space<vmem>>, %arg6: memref<512x128xbf16, #tpu.memory_space<vmem>>, %arg7: memref<1x128xf32, #tpu.memory_space<vmem>>, %arg8: memref<8x128xf32, #tpu.memory_space<vmem>>) attributes {dimension_semantics = [#tpu.dimension_semantics<parallel>], iteration_bounds = array<i64: 1>, scalar_prefetch = 0 : i64, scratch_operands = 0 : i64, tpu.core_type = #tpu.core_type<tc>, window_params = [{transform_indices = @transform_0, window_bounds = array<i64: 8, 32>}, {pipeline_mode = #tpu.pipeline_mode<synchronous>, transform_indices = @transform_1, window_bounds = array<i64: 32, 1024>}, {pipeline_mode = #tpu.pipeline_mode<synchronous>, transform_indices = @transform_2, window_bounds = array<i64: 1, 1024>}, {pipeline_mode = #tpu.pipeline_mode<synchronous>, transform_indices = @transform_3, window_bounds = array<i64: 1024, 512>}, {pipeline_mode = #tpu.pipeline_mode<synchronous>, transform_indices = @transform_4, window_bounds = array<i64: 1, 512>}, {pipeline_mode = #tpu.pipeline_mode<synchronous>, transform_indices = @transform_5, window_bounds = array<i64: 512, 128>}, {pipeline_mode = #tpu.pipeline_mode<synchronous>, transform_indices = @transform_6, window_bounds = array<i64: 1, 128>}, {transform_indices = @transform_7, window_bounds = array<i64: 8, 128>}]} {
    %c0 = arith.constant 0 : index
    %c0_0 = arith.constant 0 : index
    %0 = vector.load %arg1[%c0, %c0_0] : memref<8x32xf32, #tpu.memory_space<vmem>>, vector<8x32xf32>
    %1 = arith.truncf %0 : vector<8x32xf32> to vector<8x32xbf16>
    %c0_1 = arith.constant 0 : index
    %c0_2 = arith.constant 0 : index
    %2 = vector.load %arg2[%c0_1, %c0_2] : memref<32x1024xbf16, #tpu.memory_space<vmem>>, vector<32x1024xbf16>
    %cst = arith.constant dense<0.000000e+00> : vector<8x1024xf32>
    %3 = tpu.matmul %1, %2, %cst {dimension_numbers = #tpu.dot_dimension_numbers<[1], [0], [0], [1], [0, 0, 1, 1], [], []>} : vector<8x32xbf16>, vector<32x1024xbf16>, vector<8x1024xf32> -> vector<8x1024xf32>
    %c0_3 = arith.constant 0 : index
    %c0_4 = arith.constant 0 : index
    %4 = vector.load %arg3[%c0_3, %c0_4] : memref<1x1024xf32, #tpu.memory_space<vmem>>, vector<1x1024xf32>
    %5 = vector.broadcast %4 : vector<1x1024xf32> to vector<8x1024xf32>
    %6 = arith.addf %3, %5 : vector<8x1024xf32>
    %cst_5 = arith.constant 0.000000e+00 : f32
    %7 = vector.broadcast %cst_5 : f32 to vector<8x1024xf32>
    %8 = arith.maximumf %6, %7 : vector<8x1024xf32>
    %9 = arith.truncf %8 : vector<8x1024xf32> to vector<8x1024xbf16>
    %c0_6 = arith.constant 0 : index
    %c0_7 = arith.constant 0 : index
    %10 = vector.load %arg4[%c0_6, %c0_7] : memref<1024x512xbf16, #tpu.memory_space<vmem>>, vector<1024x512xbf16>
    %cst_8 = arith.constant dense<0.000000e+00> : vector<8x512xf32>
    %11 = tpu.matmul %9, %10, %cst_8 {dimension_numbers = #tpu.dot_dimension_numbers<[1], [0], [0], [1], [0, 0, 1, 1], [], []>} : vector<8x1024xbf16>, vector<1024x512xbf16>, vector<8x512xf32> -> vector<8x512xf32>
    %c0_9 = arith.constant 0 : index
    %c0_10 = arith.constant 0 : index
    %12 = vector.load %arg5[%c0_9, %c0_10] : memref<1x512xf32, #tpu.memory_space<vmem>>, vector<1x512xf32>
    %13 = vector.broadcast %12 : vector<1x512xf32> to vector<8x512xf32>
    %14 = arith.addf %11, %13 : vector<8x512xf32>
    %cst_11 = arith.constant 0.000000e+00 : f32
    %15 = vector.broadcast %cst_11 : f32 to vector<8x512xf32>
    %16 = arith.maximumf %14, %15 : vector<8x512xf32>
    %17 = arith.truncf %16 : vector<8x512xf32> to vector<8x512xbf16>
    %c0_12 = arith.constant 0 : index
    %c0_13 = arith.constant 0 : index
    %18 = vector.load %arg6[%c0_12, %c0_13] : memref<512x128xbf16, #tpu.memory_space<vmem>>, vector<512x128xbf16>
    %cst_14 = arith.constant dense<0.000000e+00> : vector<8x128xf32>
    %19 = tpu.matmul %17, %18, %cst_14 {dimension_numbers = #tpu.dot_dimension_numbers<[1], [0], [0], [1], [0, 0, 1, 1], [], []>} : vector<8x512xbf16>, vector<512x128xbf16>, vector<8x128xf32> -> vector<8x128xf32>
    %c0_15 = arith.constant 0 : index
    %c0_16 = arith.constant 0 : index
    %20 = vector.load %arg7[%c0_15, %c0_16] : memref<1x128xf32, #tpu.memory_space<vmem>>, vector<1x128xf32>
    %21 = vector.broadcast %20 : vector<1x128xf32> to vector<8x128xf32>
    %22 = arith.addf %19, %21 : vector<8x128xf32>
    %c0_17 = arith.constant 0 : index
    %c0_18 = arith.constant 0 : index
    %23 = vector.load %arg8[%c0_17, %c0_18] : memref<8x128xf32, #tpu.memory_space<vmem>>, vector<8x128xf32>
    tpu.vector_store %arg8[%c0_17, %c0_18], %22 {strides = array<i32>} : memref<8x128xf32, #tpu.memory_space<vmem>>, vector<8x128xf32>,
    return
  }
  func.func @transform_0(%arg0: i32) -> (i32, i32) {
    %c0_i32 = arith.constant 0 : i32
    %c0_i32_0 = arith.constant 0 : i32
    return %arg0, %c0_i32 : i32, i32
  }
  func.func @transform_1(%arg0: i32) -> (i32, i32) {
    %c0_i32 = arith.constant 0 : i32
    %c0_i32_0 = arith.constant 0 : i32
    %c0_i32_1 = arith.constant 0 : i32
    return %c0_i32, %c0_i32_0 : i32, i32
  }
  func.func @transform_2(%arg0: i32) -> (i32, i32) {
    %c0_i32 = arith.constant 0 : i32
    %c0_i32_0 = arith.constant 0 : i32
    %c0_i32_1 = arith.constant 0 : i32
    return %c0_i32, %c0_i32_0 : i32, i32
  }
  func.func @transform_3(%arg0: i32) -> (i32, i32) {
    %c0_i32 = arith.constant 0 : i32
    %c0_i32_0 = arith.constant 0 : i32
    %c0_i32_1 = arith.constant 0 : i32
    return %c0_i32, %c0_i32_0 : i32, i32
  }
  func.func @transform_4(%arg0: i32) -> (i32, i32) {
    %c0_i32 = arith.constant 0 : i32
    %c0_i32_0 = arith.constant 0 : i32
    %c0_i32_1 = arith.constant 0 : i32
    return %c0_i32, %c0_i32_0 : i32, i32
  }
  func.func @transform_5(%arg0: i32) -> (i32, i32) {
    %c0_i32 = arith.constant 0 : i32
    %c0_i32_0 = arith.constant 0 : i32
    %c0_i32_1 = arith.constant 0 : i32
    return %c0_i32, %c0_i32_0 : i32, i32
  }
  func.func @transform_6(%arg0: i32) -> (i32, i32) {
    %c0_i32 = arith.constant 0 : i32
    %c0_i32_0 = arith.constant 0 : i32
    %c0_i32_1 = arith.constant 0 : i32
    return %c0_i32, %c0_i32_0 : i32, i32
  }
  func.func @transform_7(%arg0: i32) -> (i32, i32) {
    %c0_i32 = arith.constant 0 : i32
    %c0_i32_0 = arith.constant 0 : i32
    return %arg0, %c0_i32 : i32, i32
  }
}

</mosaic_0001>

<bundles_post_ra>
// kernel: tpu_custom_call.1
= control target key start
LH: loop header
LB: loop body
LE: loop exit
PB: predicated region body
PF: predicated region fallthrough
CT: control target
= control target key end

     0   :  { %12 = vsyncpa [#allocation3], 0  ;;  %s3736_s0 = inlined_call_operand.hbm [shape: f32[8,32], index: 0, kind: input, shape index: {}]   ;;  %s3737_s1 = inlined_call_operand.hbm [shape: bf16[32,1024], index: 1, kind: input, shape index: {}]   ;;  %s3738_s2 = inlined_call_operand.hbm [shape: f32[1,1024], index: 2, kind: input, shape index: {}]   ;;  %s3739_s3 = inlined_call_operand.hbm [shape: bf16[1024,512], index: 3, kind: input, shape index: {}]   ;;  %s3740_s4 = inlined_call_operand.vmem [shape: f32[1,512], index: 4, kind: input, shape index: {}]   ;;  %s3741_s5 = inlined_call_operand.hbm [shape: bf16[512,128], index: 5, kind: input, shape index: {}]   ;;  %s3742_s6 = inlined_call_operand.vmem [shape: f32[1,128], index: 6, kind: input, shape index: {}]   ;;  %s3743_s7 = inlined_call_operand.hbm [shape: f32[8,128], index: 7, kind: output, shape index: {}]  }
   0x1   :  { %13 = vsyncpa [#allocation6], 0 }
   0x2   :  { %14 = vsyncpa [#allocation9], 0 }
   0x3   :  { %15 = vsyncpa [#allocation4], 0  ;;  %s3581_s24 = smov [#allocation5]  }
   0x4   :  { %s31_s25 = sshll.u32 %s3581_s24, 4  ;;  %s32_s25 = int_to_ptr.vmem [resolvable:$true] %s31_s25 }
   0x5   :  { %s3461_s26 = scalar_lea.vmem %s32_s25, 2048  ;;  %p3466_p1 = scmp.lt.s32.totalorder %s32_s25, %s32_s25 }
   0x6   :  { %p3462_p0 = scmp.ne.s32.totalorder %s32_s25, %s3461_s26  ;;  %p3467_p2 = scmp.lt.s32.totalorder %s3461_s26, %s3461_s26 }
   0x8   :  { %p3468_p3 = por %p3467_p2, %p3466_p1 }
   0xa   :  { %p3469_p4 = pnand %p3468_p3, %p3462_p0 }
   0xc   :  { %3472 = shalt.err (!%p3469_p4)
}
   0xd   :  { %s3582_s27 = smov 512   ;;  %s3583_s28 = smov 32  }
   0xe   :  { %37 = dma.hbm_to_vmem [thread:$0]  %s3737_s1, 2048, %s32_s25, [#allocation6], %s3582_s27, %s3582_s27, %s3583_s28  }
   0xf   :  { %s3584_s8 = smov [#allocation8]  }
  0x10   :  { %s53_s9 = sshll.u32 %s3584_s8, 4  ;;  %s54_s9 = int_to_ptr.vmem [resolvable:$true] %s53_s9 }
  0x11   :  { %s3481_s10 = scalar_lea.vmem %s54_s9, 32768  ;;  %p3486_p6 = scmp.lt.s32.totalorder %s54_s9, %s54_s9 }
  0x12   :  { %p3482_p5 = scmp.ne.s32.totalorder %s54_s9, %s3481_s10  ;;  %p3487_p7 = scmp.lt.s32.totalorder %s3481_s10, %s3481_s10 }
  0x14   :  { %p3488_p8 = por %p3487_p7, %p3486_p6 }
  0x16   :  { %p3489_p9 = pnand %p3488_p8, %p3482_p5 }
  0x18   :  { %3492 = shalt.err (!%p3489_p9)
}
  0x19   :  { %s3585_s11 = smov 256   ;;  %s3586_s12 = smov 16  }
  0x1a   :  { %59 = dma.hbm_to_vmem [thread:$0]  %s3739_s3, 32768, %s54_s9, [#allocation9], %s3585_s11, %s3585_s11, %s3586_s12  }
  0x1b   :  { %s3587_s15 = smov [#allocation2]   ;;  %s3588_s17 = smov [#allocation7]  }
  0x1c   :  { %s22_s16 = sshll.u32 %s3587_s15, 4  ;;  %s44_s1 = sshll.u32 %s3588_s17, 4  ;;  %s23_s16 = int_to_ptr.vmem [resolvable:$true] %s22_s16  ;;  %s45_s1 = int_to_ptr.vmem [resolvable:$true] %s44_s1 }
  0x1d   :  { %s3501_s18 = scalar_lea.vmem %s23_s16, 128  ;;  %p3506_p11 = scmp.lt.s32.totalorder %s23_s16, %s23_s16 }
  0x1e   :  { %p3502_p10 = scmp.ne.s32.totalorder %s23_s16, %s3501_s18  ;;  %p3507_p12 = scmp.lt.s32.totalorder %s3501_s18, %s3501_s18 }
  0x20   :  { %p3508_p13 = por %p3507_p12, %p3506_p11 }
  0x22   :  { %p3509_p0 = pnand %p3508_p13, %p3502_p10 }
  0x24   :  { %3512 = shalt.err (!%p3509_p0)
}
  0x25   :  { %25 = dma.hbm_to_vmem [thread:$0]  %s3736_s0, 128, %s23_s16, [#allocation3]  }
  0x26   :  { %s3521_s21 = scalar_lea.vmem %s45_s1, 128  ;;  %p3526_p2 = scmp.lt.s32.totalorder %s45_s1, %s45_s1 }
  0x27   :  { %p3522_p1 = scmp.ne.s32.totalorder %s45_s1, %s3521_s21  ;;  %p3527_p3 = scmp.lt.s32.totalorder %s3521_s21, %s3521_s21 }
  0x29   :  { %p3528_p4 = por %p3527_p3, %p3526_p2 }
  0x2b   :  { %p3529_p5 = pnand %p3528_p4, %p3522_p1 }
  0x2d   :  { %3532 = shalt.err (!%p3529_p5)
}
  0x2e   :  { %47 = dma.hbm_to_vmem [thread:$0]  %s3738_s2, 128, %s45_s1, [#allocation6]  }
  0x2f   :  { %s3589_s23 = smov [#allocation10]  }
  0x30   :  { %s67_s24 = sshll.u32 %s3589_s23, 4  ;;  %s68_s24 = int_to_ptr.vmem [resolvable:$true] %s67_s24 }
  0x31   :  { %s3541_s25 = scalar_lea.vmem %s68_s24, 4096  ;;  %p3546_p7 = scmp.lt.s32.totalorder %s68_s24, %s68_s24 }
  0x32   :  { %p3542_p6 = scmp.ne.s32.totalorder %s68_s24, %s3541_s25  ;;  %p3547_p8 = scmp.lt.s32.totalorder %s3541_s25, %s3541_s25 }
  0x34   :  { %p3548_p9 = por %p3547_p8, %p3546_p7 }
  0x36   :  { %p3549_p10 = pnand %p3548_p9, %p3542_p6 }
  0x38   :  { %3552 = shalt.err (!%p3549_p10)
}
  0x39   :  { %s3590_s0 = smov 64   ;;  %s3591_s26 = smov 4  }
  0x3a   :  { %73 = dma.hbm_to_vmem [thread:$0]  %s3741_s5, 4096, %s68_s24, [#allocation9], %s3590_s0, %s3590_s0, %s3591_s26  }
  0x3b   :  { %3573 = dma.done.wait [#allocation3], 128  }
  0x3c   :  { %3574 = vsyncadd [#allocation3], 4294967168 }
  0x3d   :  { %3575 = dma.done.wait [#allocation6], 2176  }
  0x3e   :  { %3576 = vsyncadd [#allocation6], 4294965120 }
  0x3f   :  { %3577 = dma.done.wait [#allocation9], 36864  }
  0x40   :  { %3578 = vsyncadd [#allocation9], 4294930432  ;;  %v3592_v0 = vmov 0   ;;  %v102_v1 = vld [vmem:[#allocation5 + $0x40] sm:$0xff]  ;;  %v103_v3 = vld [vmem:[#allocation5 + $0x48] sm:$0xff]  ;;  %vm232_vm0 = vcmask 261120  }
  0x41   :  { %268 = vmatprep.mubr.bf16.mxu0 %v3592_v0  ;;  %309 = vmatprep.mubr.bf16.mxu1 %v3592_v0  ;;  %v106_v2 = vld [vmem:[#allocation5 + $0x60] sm:$0xff]  ;;  %v107_v5 = vld [vmem:[#allocation5 + $0x68] sm:$0xff]  ;;  %v104_v15 = vld [vmem:[#allocation5 + $0x50] sm:$0xff]  ;;  %s3593_s30 = smov [#allocation11]  }
  0x42   :  { %v2680_v4 = vcombine.high %v102_v1, %v106_v2  ;;  %v2679_v6 = vcombine.low %v102_v1, %v106_v2  ;;  %v94_v7 = vld [vmem:[#allocation5] sm:$0xff]  ;;  %v2682_v9 = vcombine.high %v103_v3, %v107_v5  ;;  %v2681_v10 = vcombine.low %v103_v3, %v107_v5  ;;  %v95_v12 = vld [vmem:[#allocation5 + $0x8] sm:$0xff]  ;;  %v108_v16 = vld [vmem:[#allocation5 + $0x70] sm:$0xff]  ;;  %s2660_s8 = sshll.u32 %s3593_s30, 4  ;;  %s2661_s8 = int_to_ptr.vmem [resolvable:$true] %s2660_s8 }
  0x43   :  { %v98_v8 = vld [vmem:[#allocation5 + $0x20] sm:$0xff]  ;;  %v99_v13 = vld [vmem:[#allocation5 + $0x28] sm:$0xff]  ;;  %v105_v17 = vld [vmem:[#allocation5 + $0x58] sm:$0xff]  ;;  %v2684_v22 = vcombine.high %v104_v15, %v108_v16  ;;  %v2683_v29 = vcombine.low %v104_v15, %v108_v16  ;;  %s3553_s9 = scalar_lea.vmem %s2661_s8, 128  ;;  %p3558_p12 = scmp.lt.s32.totalorder %s2661_s8, %s2661_s8 }
  0x44   :  { %v2672_v11 = vcombine.high %v94_v7, %v98_v8  ;;  %248 = vmatprep.subr.bf16.mxu0 %v2680_v4  ;;  %v2674_v14 = vcombine.high %v95_v12, %v99_v13  ;;  %289 = vmatprep.subr.bf16.mxu1 %v2682_v9  ;;  %v2671_v18 = vcombine.low %v94_v7, %v98_v8  ;;  %v92_v19 = vld [vmem:[#allocation2] sm:$0xff]  ;;  %v96_v23 = vld [vmem:[#allocation5 + $0x10] sm:$0xff]  ;;  %p3554_p11 = scmp.ne.s32.totalorder %s2661_s8, %s3553_s9  ;;  %p3559_p13 = scmp.lt.s32.totalorder %s3553_s9, %s3553_s9 }
  0x45   :  { %249 = vmatpush1.bf16.msra.mxu0 %v2679_v6  ;;  %v109_v20 = vld [vmem:[#allocation5 + $0x78] sm:$0xff]  ;;  %290 = vmatpush1.bf16.msra.mxu1 %v2681_v10  ;;  %v2673_v21 = vcombine.low %v95_v12, %v99_v13  ;;  %v100_v25 = vld [vmem:[#allocation5 + $0x30] sm:$0xff]  ;;  %v93_v27 = vpack.c.bf16 %v92_v19, %v92_v19 }
  0x46   :  { %250 = vmatprep.subr.bf16.mxu0 %v2672_v11  ;;  %291 = vmatprep.subr.bf16.mxu1 %v2674_v14  ;;  %v2686_v24 = vcombine.high %v105_v17, %v109_v20  ;;  %v97_v26 = vld [vmem:[#allocation5 + $0x18] sm:$0xff]  ;;  %v2685_v30 = vcombine.low %v105_v17, %v109_v20  ;;  %v2676_v31 = vcombine.high %v96_v23, %v100_v25  ;;  %p3560_p0 = por %p3559_p13, %p3558_p12 }
  0x47   :  { %v101_v28 = vld [vmem:[#allocation5 + $0x38] sm:$0xff]  ;;  %v2675_v33 = vcombine.low %v96_v23, %v100_v25 }
  0x48   :  { %v2678_v32 = vcombine.high %v97_v26, %v101_v28  ;;  %v2677_v34 = vcombine.low %v97_v26, %v101_v28  ;;  %v3039_v35 = vld [vmem:[#allocation8 + $0xe4] ss:$16 sps:$4 sm:$0xff]   ;;  %v3037_v37 = vld [vmem:[#allocation8 + $0xe0] ss:$16 sps:$4 sm:$0xff]   ;;  %p3561_p1 = pnand %p3560_p0, %p3554_p11 }
  0x49   :  { %251 = vmatpush1.bf16.msra.mxu0 %v2671_v18  ;;  %292 = vmatpush1.bf16.msra.mxu1 %v2673_v21  ;;  %v3042_v36 = vld [vmem:[#allocation8 + $0x2e4] ss:$16 sps:$4 sm:$0xff]   ;;  %v3040_v38 = vld [vmem:[#allocation8 + $0x2e0] ss:$16 sps:$4 sm:$0xff]  }
  0x4a   :  { %330 = vmatprep.subr.bf16.mxu0 %v2684_v22  ;;  %371 = vmatprep.subr.bf16.mxu1 %v2686_v24  ;;  %v3045_v39 = vld [vmem:[#allocation8 + $0xc4] ss:$16 sps:$4 sm:$0xff]   ;;  %v3043_v41 = vld [vmem:[#allocation8 + $0xc0] ss:$16 sps:$4 sm:$0xff]  }
  0x4b   :  { %v3048_v40 = vld [vmem:[#allocation8 + $0x2c4] ss:$16 sps:$4 sm:$0xff]   ;;  %v3046_v42 = vld [vmem:[#allocation8 + $0x2c0] ss:$16 sps:$4 sm:$0xff]  }
  0x4c   :  { %2687 = vmatmul.mubr.msk.bf16.vlgmr.msra.gmra.mxu0 %vm232_vm0, %v93_v27  ;;  %2688 = vmatmul.mubr.msk.bf16.vlgmr.msra.gmra.mxu1 %vm232_vm0, %v93_v27  ;;  %v3051_v43 = vld [vmem:[#allocation8 + $0xa4] ss:$16 sps:$4 sm:$0xff]   ;;  %v3049_v45 = vld [vmem:[#allocation8 + $0xa0] ss:$16 sps:$4 sm:$0xff]  }
  0x4d   :  { %331 = vmatpush1.bf16.msra.mxu0 %v2683_v29  ;;  %372 = vmatpush1.bf16.msra.mxu1 %v2685_v30  ;;  %v3054_v44 = vld [vmem:[#allocation8 + $0x2a4] ss:$16 sps:$4 sm:$0xff]   ;;  %v3052_v46 = vld [vmem:[#allocation8 + $0x2a0] ss:$16 sps:$4 sm:$0xff]  }
  0x4e   :  { %332 = vmatprep.subr.bf16.mxu0 %v2676_v31  ;;  %373 = vmatprep.subr.bf16.mxu1 %v2678_v32  ;;  %v3057_v47 = vld [vmem:[#allocation8 + $0x84] ss:$16 sps:$4 sm:$0xff]   ;;  %v3055_v49 = vld [vmem:[#allocation8 + $0x80] ss:$16 sps:$4 sm:$0xff]  }
  0x4f   :  { %350 = vmatprep.mubr.bf16.mxu0 %v3592_v0  ;;  %391 = vmatprep.mubr.bf16.mxu1 %v3592_v0  ;;  %v3060_v48 = vld [vmem:[#allocation8 + $0x284] ss:$16 sps:$4 sm:$0xff]   ;;  %v3058_v50 = vld [vmem:[#allocation8 + $0x280] ss:$16 sps:$4 sm:$0xff]  }
  0x50   :  { %v3063_v51 = vld [vmem:[#allocation8 + $0x64] ss:$16 sps:$4 sm:$0xff]   ;;  %v3061_v53 = vld [vmem:[#allocation8 + $0x60] ss:$16 sps:$4 sm:$0xff]  }
  0x51   :  { %333 = vmatpush1.bf16.msra.mxu0 %v2675_v33  ;;  %374 = vmatpush1.bf16.msra.mxu1 %v2677_v34  ;;  %v3066_v52 = vld [vmem:[#allocation8 + $0x264] ss:$16 sps:$4 sm:$0xff]   ;;  %v3064_v54 = vld [vmem:[#allocation8 + $0x260] ss:$16 sps:$4 sm:$0xff]  }
  0x52   :  { %1974 = vmatprep.subr.bf16.mxu0 %v3039_v35  ;;  %2015 = vmatprep.subr.bf16.mxu1 %v3042_v36  ;;  %v3069_v55 = vld [vmem:[#allocation8 + $0x44] ss:$16 sps:$4 sm:$0xff]   ;;  %v3067_v57 = vld [vmem:[#allocation8 + $0x40] ss:$16 sps:$4 sm:$0xff]  }
  0x53   :  { %v3072_v56 = vld [vmem:[#allocation8 + $0x244] ss:$16 sps:$4 sm:$0xff]   ;;  %v3070_v58 = vld [vmem:[#allocation8 + $0x240] ss:$16 sps:$4 sm:$0xff]  }
  0x54   :  { %2689 = vmatmul.mubr.msk.bf16.vlgmr.msra.gmra.mxu0 %vm232_vm0, %v93_v27  ;;  %2690 = vmatmul.mubr.msk.bf16.vlgmr.msra.gmra.mxu1 %vm232_vm0, %v93_v27  ;;  %v3075_v59 = vld [vmem:[#allocation8 + $0x24] ss:$16 sps:$4 sm:$0xff]   ;;  %v3073_v61 = vld [vmem:[#allocation8 + $0x20] ss:$16 sps:$4 sm:$0xff]  }
  0x55   :  { %1975 = vmatpush1.bf16.msra.mxu0 %v3037_v37  ;;  %2016 = vmatpush1.bf16.msra.mxu1 %v3040_v38  ;;  %v3078_v60 = vld [vmem:[#allocation8 + $0x224] ss:$16 sps:$4 sm:$0xff]   ;;  %v3076_v62 = vld [vmem:[#allocation8 + $0x220] ss:$16 sps:$4 sm:$0xff]   ;;  %v112_v37 = vlaneseq }
  0x56   :  { %1976 = vmatprep.subr.bf16.mxu0 %v3045_v39  ;;  %2017 = vmatprep.subr.bf16.mxu1 %v3048_v40  ;;  %v3081_v63 = vld [vmem:[#allocation8 + $0x4] ss:$16 sps:$4 sm:$0xff]   ;;  %v3079_v0 = vld [vmem:[#allocation8] ss:$16 sps:$4 sm:$0xff]   ;;  %v3656_v40 = vld [vmem:[#allocation7] sm:$0xff] }
  0x57   :  { %v3084_v1 = vld [vmem:[#allocation8 + $0x204] ss:$16 sps:$4 sm:$0xff]   ;;  %v3082_v2 = vld [vmem:[#allocation8 + $0x200] ss:$16 sps:$4 sm:$0xff]   ;;  %v3653_v38 = vshrl.u32 %v112_v37, 7 }
  0x58   :  { %v3087_v3 = vld [vmem:[#allocation8 + $0x1e4] ss:$16 sps:$4 sm:$0xff]   ;;  %v3085_v5 = vld [vmem:[#allocation8 + $0x1e0] ss:$16 sps:$4 sm:$0xff]  }
  0x59   :  { %1977 = vmatpush1.bf16.msra.mxu0 %v3043_v41  ;;  %2018 = vmatpush1.bf16.msra.mxu1 %v3046_v42  ;;  %v3090_v4 = vld [vmem:[#allocation8 + $0x3e4] ss:$16 sps:$4 sm:$0xff]   ;;  %v3088_v6 = vld [vmem:[#allocation8 + $0x3e0] ss:$16 sps:$4 sm:$0xff]   ;;  %v114_v39 = vsub.s32 0, %v3653_v38  ;;  %v122_v41 = vsub.s32 2, %v3653_v38 }
  0x5a   :  { %1978 = vmatprep.subr.bf16.mxu0 %v3051_v43  ;;  %2019 = vmatprep.subr.bf16.mxu1 %v3054_v44  ;;  %v3093_v7 = vld [vmem:[#allocation8 + $0x1c4] ss:$16 sps:$4 sm:$0xff]   ;;  %v3091_v9 = vld [vmem:[#allocation8 + $0x1c0] ss:$16 sps:$4 sm:$0xff]   ;;  %v118_v42 = vsub.s32 1, %v3653_v38  ;;  %v126_v43 = vsub.s32 3, %v3653_v38 }
  0x5b   :  { %v3096_v8 = vld [vmem:[#allocation8 + $0x3c4] ss:$16 sps:$4 sm:$0xff]   ;;  %v3094_v10 = vld [vmem:[#allocation8 + $0x3c0] ss:$16 sps:$4 sm:$0xff]   ;;  %v115_v44 = vrot.slane %v3656_v40, %v114_v39 }
  0x5c   :  { %v3099_v11 = vld [vmem:[#allocation8 + $0x1a4] ss:$16 sps:$4 sm:$0xff]   ;;  %v3097_v13 = vld [vmem:[#allocation8 + $0x1a0] ss:$16 sps:$4 sm:$0xff]  }
  0x5d   :  { %1979 = vmatpush1.bf16.msra.mxu0 %v3049_v45  ;;  %2020 = vmatpush1.bf16.msra.mxu1 %v3052_v46  ;;  %v3102_v12 = vld [vmem:[#allocation8 + $0x3a4] ss:$16 sps:$4 sm:$0xff]   ;;  %v3100_v14 = vld [vmem:[#allocation8 + $0x3a0] ss:$16 sps:$4 sm:$0xff]   ;;  %v123_v45 = vrot.slane %v3656_v40, %v122_v41  ;;  %v119_v46 = vrot.slane %v3656_v40, %v118_v42 }
  0x5e   :  { %1980 = vmatprep.subr.bf16.mxu0 %v3057_v47  ;;  %2021 = vmatprep.subr.bf16.mxu1 %v3060_v48  ;;  %v3105_v15 = vld [vmem:[#allocation8 + $0x184] ss:$16 sps:$4 sm:$0xff]   ;;  %v3103_v17 = vld [vmem:[#allocation8 + $0x180] ss:$16 sps:$4 sm:$0xff]   ;;  %v127_v48 = vrot.slane %v3656_v40, %v126_v43 }
  0x5f   :  { %v3108_v16 = vld [vmem:[#allocation8 + $0x384] ss:$16 sps:$4 sm:$0xff]   ;;  %v3106_v18 = vld [vmem:[#allocation8 + $0x380] ss:$16 sps:$4 sm:$0xff]  }
  0x60   :  { %v3111_v19 = vld [vmem:[#allocation8 + $0x164] ss:$16 sps:$4 sm:$0xff]   ;;  %v3109_v21 = vld [vmem:[#allocation8 + $0x160] ss:$16 sps:$4 sm:$0xff]  }
  0x61   :  { %1981 = vmatpush1.bf16.msra.mxu0 %v3055_v49  ;;  %2022 = vmatpush1.bf16.msra.mxu1 %v3058_v50  ;;  %v3114_v20 = vld [vmem:[#allocation8 + $0x364] ss:$16 sps:$4 sm:$0xff]   ;;  %v3112_v22 = vld [vmem:[#allocation8 + $0x360] ss:$16 sps:$4 sm:$0xff]  }
  0x62   :  { %1982 = vmatprep.subr.bf16.mxu0 %v3063_v51  ;;  %2023 = vmatprep.subr.bf16.mxu1 %v3066_v52  ;;  %v3117_v23 = vld [vmem:[#allocation8 + $0x144] ss:$16 sps:$4 sm:$0xff]   ;;  %v3115_v25 = vld [vmem:[#allocation8 + $0x140] ss:$16 sps:$4 sm:$0xff]  }
  0x63   :  { %v3120_v24 = vld [vmem:[#allocation8 + $0x344] ss:$16 sps:$4 sm:$0xff]   ;;  %v3118_v26 = vld [vmem:[#allocation8 + $0x340] ss:$16 sps:$4 sm:$0xff]  }
  0x64   :  { %v3123_v27 = vld [vmem:[#allocation8 + $0x124] ss:$16 sps:$4 sm:$0xff]   ;;  %v3121_v29 = vld [vmem:[#allocation8 + $0x120] ss:$16 sps:$4 sm:$0xff]  }
  0x65   :  { %1983 = vmatpush1.bf16.msra.mxu0 %v3061_v53  ;;  %2024 = vmatpush1.bf16.msra.mxu1 %v3064_v54  ;;  %v3126_v28 = vld [vmem:[#allocation8 + $0x324] ss:$16 sps:$4 sm:$0xff]   ;;  %v3124_v30 = vld [vmem:[#allocation8 + $0x320] ss:$16 sps:$4 sm:$0xff]  }
  0x66   :  { %1984 = vmatprep.subr.bf16.mxu0 %v3069_v55  ;;  %2025 = vmatprep.subr.bf16.mxu1 %v3072_v56  ;;  %v3129_v31 = vld [vmem:[#allocation8 + $0x104] ss:$16 sps:$4 sm:$0xff]   ;;  %v3127_v33 = vld [vmem:[#allocation8 + $0x100] ss:$16 sps:$4 sm:$0xff]   ;;  %v134_v55 = vsub.s32 5, %v3653_v38 }
  0x67   :  { %v3132_v32 = vld [vmem:[#allocation8 + $0x304] ss:$16 sps:$4 sm:$0xff]   ;;  %v3130_v34 = vld [vmem:[#allocation8 + $0x300] ss:$16 sps:$4 sm:$0xff]  }
  0x68   :  { %v3135_v35 = vld [vmem:[#allocation8 + $0x4e4] ss:$16 sps:$4 sm:$0xff]  }
  0x69   :  { %1985 = vmatpush1.bf16.msra.mxu0 %v3067_v57  ;;  %2026 = vmatpush1.bf16.msra.mxu1 %v3070_v58  ;;  %v3138_v36 = vld [vmem:[#allocation8 + $0x6e4] ss:$16 sps:$4 sm:$0xff]  }
  0x6a   :  { %1986 = vmatprep.subr.bf16.mxu0 %v3075_v59  ;;  %2027 = vmatprep.subr.bf16.mxu1 %v3078_v60  ;;  %v142_v60 = vsub.s32 7, %v3653_v38  ;;  %v3162_v37 = vld [vmem:[#allocation8 + $0x664] ss:$16 sps:$4 sm:$0xff]  }
  0x6d   :  { %1987 = vmatpush1.bf16.msra.mxu0 %v3073_v61  ;;  %2028 = vmatpush1.bf16.msra.mxu1 %v3076_v62 }
  0x6e   :  { %1988 = vmatprep.subr.bf16.mxu0 %v3081_v63  ;;  %2029 = vmatprep.subr.bf16.mxu1 %v3084_v1 }
  0x71   :  { %1989 = vmatpush1.bf16.msra.mxu0 %v3079_v0  ;;  %2030 = vmatpush1.bf16.msra.mxu1 %v3082_v2 }
  0x72   :  { %1990 = vmatprep.subr.bf16.mxu0 %v3087_v3  ;;  %2031 = vmatprep.subr.bf16.mxu1 %v3090_v4  ;;  %v3133_v4 = vld [vmem:[#allocation8 + $0x4e0] ss:$16 sps:$4 sm:$0xff]  }
  0x75   :  { %1991 = vmatpush2.bf16.msra.mxu0 %v3085_v5  ;;  %2032 = vmatpush2.bf16.msra.mxu1 %v3088_v6  ;;  %v135_v5 = vrot.slane %v3656_v40, %v134_v55  ;;  %v3180_v55 = vld [vmem:[#allocation8 + $0x604] ss:$16 sps:$4 sm:$0xff]  }
  0x76   :  { %1992 = vmatprep.subr.bf16.mxu0 %v3093_v7  ;;  %2033 = vmatprep.subr.bf16.mxu1 %v3096_v8  ;;  %v3136_v8 = vld [vmem:[#allocation8 + $0x6e0] ss:$16 sps:$4 sm:$0xff]  }
  0x79   :  { %1993 = vmatpush2.bf16.msra.mxu0 %v3091_v9  ;;  %2034 = vmatpush2.bf16.msra.mxu1 %v3094_v10  ;;  %v3141_v9 = vld [vmem:[#allocation8 + $0x4c4] ss:$16 sps:$4 sm:$0xff]  }
  0x7a   :  { %1994 = vmatprep.subr.bf16.mxu0 %v3099_v11  ;;  %2035 = vmatprep.subr.bf16.mxu1 %v3102_v12  ;;  %v143_v11 = vrot.slane %v3656_v40, %v142_v60  ;;  %v3144_v12 = vld [vmem:[#allocation8 + $0x6c4] ss:$16 sps:$4 sm:$0xff]   ;;  %v3181_v60 = vld [vmem:[#allocation8 + $0x5e0] ss:$16 sps:$4 sm:$0xff]  }
  0x7d   :  { %1995 = vmatpush2.bf16.msra.mxu0 %v3097_v13  ;;  %2036 = vmatpush2.bf16.msra.mxu1 %v3100_v14 }
  0x7e   :  { %1996 = vmatprep.subr.bf16.mxu0 %v3105_v15  ;;  %2037 = vmatprep.subr.bf16.mxu1 %v3108_v16  ;;  %v3139_v15 = vld [vmem:[#allocation8 + $0x4c0] ss:$16 sps:$4 sm:$0xff]  }
  0x81   :  { %1997 = vmatpush2.bf16.msra.mxu0 %v3103_v17  ;;  %2038 = vmatpush2.bf16.msra.mxu1 %v3106_v18  ;;  %v3142_v18 = vld [vmem:[#allocation8 + $0x6c0] ss:$16 sps:$4 sm:$0xff]  }
  0x82   :  { %1998 = vmatprep.subr.bf16.mxu0 %v3111_v19  ;;  %2039 = vmatprep.subr.bf16.mxu1 %v3114_v20  ;;  %v3147_v19 = vld [vmem:[#allocation8 + $0x4a4] ss:$16 sps:$4 sm:$0xff]  }
  0x85   :  { %1999 = vmatpush2.bf16.msra.mxu0 %v3109_v21  ;;  %2040 = vmatpush2.bf16.msra.mxu1 %v3112_v22  ;;  %v3150_v22 = vld [vmem:[#allocation8 + $0x6a4] ss:$16 sps:$4 sm:$0xff]  }
  0x86   :  { %2000 = vmatprep.subr.bf16.mxu0 %v3117_v23  ;;  %2041 = vmatprep.subr.bf16.mxu1 %v3120_v24 }
  0x89   :  { %2001 = vmatpush2.bf16.msra.mxu0 %v3115_v25  ;;  %2042 = vmatpush2.bf16.msra.mxu1 %v3118_v26 }
  0x8a   :  { %2002 = vmatprep.subr.bf16.mxu0 %v3123_v27  ;;  %2043 = vmatprep.subr.bf16.mxu1 %v3126_v28  ;;  %v3145_v27 = vld [vmem:[#allocation8 + $0x4a0] ss:$16 sps:$4 sm:$0xff]  }
  0x8d   :  { %2003 = vmatpush2.bf16.msra.mxu0 %v3121_v29  ;;  %2044 = vmatpush2.bf16.msra.mxu1 %v3124_v30  ;;  %v3148_v30 = vld [vmem:[#allocation8 + $0x6a0] ss:$16 sps:$4 sm:$0xff]  }
  0x8e   :  { %2004 = vmatprep.subr.bf16.mxu0 %v3129_v31  ;;  %2045 = vmatprep.subr.bf16.mxu1 %v3132_v32  ;;  %v3153_v31 = vld [vmem:[#allocation8 + $0x484] ss:$16 sps:$4 sm:$0xff]  }
  0x91   :  { %2005 = vmatpush2.bf16.msra.mxu0 %v3127_v33  ;;  %2046 = vmatpush2.bf16.msra.mxu1 %v3130_v34  ;;  %v3156_v33 = vld [vmem:[#allocation8 + $0x684] ss:$16 sps:$4 sm:$0xff]   ;;  %v3151_v34 = vld [vmem:[#allocation8 + $0x480] ss:$16 sps:$4 sm:$0xff]  }
  0x92   :  { %2056 = vmatprep.subr.bf16.mxu0 %v3135_v35  ;;  %2097 = vmatprep.subr.bf16.mxu1 %v3138_v36  ;;  %v3154_v35 = vld [vmem:[#allocation8 + $0x680] ss:$16 sps:$4 sm:$0xff]   ;;  %v3159_v36 = vld [vmem:[#allocation8 + $0x464] ss:$16 sps:$4 sm:$0xff]  }
 0x10c   :  { %v270_v47 = vpop.f32.mrf.mxu0  ;;  %v311_v50 = vpop.f32.mrf.mxu1 }
 0x10d   :  { %v271_v49 = vadd.f32 %v270_v47, %v115_v44  ;;  %v312_v51 = vadd.f32 %v311_v50, %v123_v45  ;;  %v3157_v44 = vld [vmem:[#allocation8 + $0x460] ss:$16 sps:$4 sm:$0xff]   ;;  %v3168_v47 = vld [vmem:[#allocation8 + $0x644] ss:$16 sps:$4 sm:$0xff]  }
 0x10e   :  { %v272_v52 = vpop.f32.mrf.mxu0  ;;  %v313_v54 = vpop.f32.mrf.mxu1  ;;  %v3160_v45 = vld [vmem:[#allocation8 + $0x660] ss:$16 sps:$4 sm:$0xff]   ;;  %v3171_v50 = vld [vmem:[#allocation8 + $0x424] ss:$16 sps:$4 sm:$0xff]  }
 0x10f   :  { %v273_v53 = vadd.f32 %v272_v52, %v119_v46  ;;  %v400_v56 = vmax.f32 %v271_v49, 0.0  ;;  %v402_v57 = vmax.f32 %v312_v51, 0.0  ;;  %v314_v58 = vadd.f32 %v313_v54, %v127_v48  ;;  %v3165_v46 = vld [vmem:[#allocation8 + $0x444] ss:$16 sps:$4 sm:$0xff]   ;;  %v3163_v48 = vld [vmem:[#allocation8 + $0x440] ss:$16 sps:$4 sm:$0xff]  }
 0x110   :  { %v274_v59 = vpop.f32.mrf.mxu0  ;;  %v315_v62 = vpop.f32.mrf.mxu1  ;;  %v3166_v49 = vld [vmem:[#allocation8 + $0x640] ss:$16 sps:$4 sm:$0xff]   ;;  %v3174_v51 = vld [vmem:[#allocation8 + $0x624] ss:$16 sps:$4 sm:$0xff]  }
 0x111   :  { %v401_v61 = vmax.f32 %v273_v53, 0.0  ;;  %v403_v63 = vmax.f32 %v314_v58, 0.0  ;;  %v3675_v1 = vpack.c.bf16 %v402_v57, %v402_v57  ;;  %v3680_v6 = vpack.c.bf16 %v400_v56, %v400_v56  ;;  %v3169_v52 = vld [vmem:[#allocation8 + $0x420] ss:$16 sps:$4 sm:$0xff]   ;;  %v3177_v54 = vld [vmem:[#allocation8 + $0x404] ss:$16 sps:$4 sm:$0xff]  }
 0x112   :  { %v275_v0 = vpop.f32.mrf.mxu0  ;;  %v316_v3 = vpop.f32.mrf.mxu1  ;;  %v3172_v53 = vld [vmem:[#allocation8 + $0x620] ss:$16 sps:$4 sm:$0xff]   ;;  %v3183_v58 = vld [vmem:[#allocation8 + $0x5e4] ss:$16 sps:$4 sm:$0xff]  }
 0x113   :  { %v3677_v2 = vpack.c.bf16 %v401_v61, %v401_v61  ;;  %v3682_v7 = vpack.c.bf16 %v403_v63, %v403_v63  ;;  %v3175_v56 = vld [vmem:[#allocation8 + $0x400] ss:$16 sps:$4 sm:$0xff]   ;;  %v3186_v59 = vld [vmem:[#allocation8 + $0x7e4] ss:$16 sps:$4 sm:$0xff]  }
 0x114   :  { %v3684_v10 = vpop.f32.mrf.mxu0  ;;  %v3688_v13 = vpop.f32.mrf.mxu1  ;;  %v3178_v57 = vld [vmem:[#allocation8 + $0x600] ss:$16 sps:$4 sm:$0xff]   ;;  %v3189_v62 = vld [vmem:[#allocation8 + $0x5c4] ss:$16 sps:$4 sm:$0xff]  }
 0x115   :  { %2006 = vmatprep.mubr.bf16.mxu0 %v3677_v2  ;;  %2047 = vmatprep.mubr.bf16.mxu1 %v3682_v7  ;;  %v3184_v61 = vld [vmem:[#allocation8 + $0x7e0] ss:$16 sps:$4 sm:$0xff]   ;;  %v3192_v63 = vld [vmem:[#allocation8 + $0x7c4] ss:$16 sps:$4 sm:$0xff]  }
 0x116   :  { %2007 = vmatmul.mubr.bf16.vlgmr.msra.gmra.mxu0 %v3680_v6  ;;  %v354_v14 = vpop.f32.mrf.mxu0  ;;  %2048 = vmatmul.mubr.bf16.vlgmr.msra.gmra.mxu1 %v3675_v1  ;;  %v395_v17 = vpop.f32.mrf.mxu1  ;;  %v3187_v0 = vld [vmem:[#allocation8 + $0x5c0] ss:$16 sps:$4 sm:$0xff]  }
 0x117   :  { %2057 = vmatpush1.bf16.msra.mxu0 %v3133_v4  ;;  %v355_v16 = vadd.f32 %v354_v14, %v135_v5  ;;  %2098 = vmatpush1.bf16.msra.mxu1 %v3136_v8  ;;  %v396_v21 = vadd.f32 %v395_v17, %v143_v11  ;;  %v3190_v3 = vld [vmem:[#allocation8 + $0x7c0] ss:$16 sps:$4 sm:$0xff]   ;;  %v3195_v4 = vld [vmem:[#allocation8 + $0x5a4] ss:$16 sps:$4 sm:$0xff]  }
 0x118   :  { %2058 = vmatprep.subr.bf16.mxu0 %v3141_v9  ;;  %v356_v20 = vpop.f32.mrf.mxu0  ;;  %2099 = vmatprep.subr.bf16.mxu1 %v3144_v12  ;;  %v397_v24 = vpop.f32.mrf.mxu1  ;;  %v3198_v5 = vld [vmem:[#allocation8 + $0x7a4] ss:$16 sps:$4 sm:$0xff]   ;;  %v3193_v8 = vld [vmem:[#allocation8 + $0x5a0] ss:$16 sps:$4 sm:$0xff]  }
 0x119   :  { %v405_v23 = vmax.f32 %v355_v16, 0.0  ;;  %v407_v25 = vmax.f32 %v396_v21, 0.0  ;;  %v3196_v9 = vld [vmem:[#allocation8 + $0x7a0] ss:$16 sps:$4 sm:$0xff]   ;;  %v3201_v11 = vld [vmem:[#allocation8 + $0x584] ss:$16 sps:$4 sm:$0xff]  }
 0x11a   :  { %v357_v26 = vpop.f32.mrf.mxu0  ;;  %v398_v29 = vpop.f32.mrf.mxu1  ;;  %v3204_v12 = vld [vmem:[#allocation8 + $0x784] ss:$16 sps:$4 sm:$0xff]   ;;  %v3199_v14 = vld [vmem:[#allocation8 + $0x580] ss:$16 sps:$4 sm:$0xff]   ;;  %v130_v21 = vsub.s32 4, %v3653_v38 }
 0x11b   :  { %2059 = vmatpush1.bf16.msra.mxu0 %v3139_v15  ;;  %v3693_v28 = vpack.c.bf16 %v405_v23, %v405_v23  ;;  %2100 = vmatpush1.bf16.msra.mxu1 %v3142_v18  ;;  %v3695_v32 = vpack.c.bf16 %v407_v25, %v407_v25  ;;  %v3202_v15 = vld [vmem:[#allocation8 + $0x780] ss:$16 sps:$4 sm:$0xff]   ;;  %v3207_v16 = vld [vmem:[#allocation8 + $0x564] ss:$16 sps:$4 sm:$0xff]  }
 0x11c   :  { %2060 = vmatprep.subr.bf16.mxu0 %v3147_v19  ;;  %2101 = vmatprep.subr.bf16.mxu1 %v3150_v22  ;;  %v3210_v17 = vld [vmem:[#allocation8 + $0x764] ss:$16 sps:$4 sm:$0xff]   ;;  %v3205_v18 = vld [vmem:[#allocation8 + $0x560] ss:$16 sps:$4 sm:$0xff]   ;;  %v138_v19 = vsub.s32 6, %v3653_v38  ;;  %v131_v26 = vrot.slane %v3656_v40, %v130_v21 }
 0x11d   :  { %2088 = vmatprep.mubr.bf16.mxu0 %v3693_v28  ;;  %2129 = vmatprep.mubr.bf16.mxu1 %v3695_v32  ;;  %v3208_v20 = vld [vmem:[#allocation8 + $0x760] ss:$16 sps:$4 sm:$0xff]   ;;  %v3213_v22 = vld [vmem:[#allocation8 + $0x544] ss:$16 sps:$4 sm:$0xff]   ;;  %v3277_v21 = vld [vmem:[#allocation8 + $0x1e8] ss:$16 sps:$4 sm:$0xff]  }
 0x11e   :  { %v3216_v23 = vld [vmem:[#allocation8 + $0x744] ss:$16 sps:$4 sm:$0xff]   ;;  %v139_v24 = vrot.slane %v3656_v40, %v138_v19  ;;  %v3211_v25 = vld [vmem:[#allocation8 + $0x540] ss:$16 sps:$4 sm:$0xff]   ;;  %v3279_v19 = vld [vmem:[#allocation8 + $0x1ec] ss:$16 sps:$4 sm:$0xff]  }
 0x11f   :  { %2061 = vmatpush1.bf16.msra.mxu0 %v3145_v27  ;;  %2102 = vmatpush1.bf16.msra.mxu1 %v3148_v30  ;;  %v3214_v27 = vld [vmem:[#allocation8 + $0x740] ss:$16 sps:$4 sm:$0xff]   ;;  %v3219_v29 = vld [vmem:[#allocation8 + $0x524] ss:$16 sps:$4 sm:$0xff]  }
 0x120   :  { %2062 = vmatprep.subr.bf16.mxu0 %v3153_v31  ;;  %2103 = vmatprep.subr.bf16.mxu1 %v3156_v33  ;;  %v3222_v30 = vld [vmem:[#allocation8 + $0x724] ss:$16 sps:$4 sm:$0xff]   ;;  %v394_v31 = vadd.f32 %v3688_v13, %v139_v24  ;;  %v3217_v33 = vld [vmem:[#allocation8 + $0x520] ss:$16 sps:$4 sm:$0xff]   ;;  %v3234_v13 = vld [vmem:[#allocation8 + $0x2ec] ss:$16 sps:$4 sm:$0xff]  }
 0x121   :  { %v3223_v40 = vld [vmem:[#allocation8 + $0x500] ss:$16 sps:$4 sm:$0xff]   ;;  %v3288_v24 = vld [vmem:[#allocation8 + $0x3cc] ss:$16 sps:$4 sm:$0xff]  }
 0x123   :  { %2063 = vmatpush1.bf16.msra.mxu0 %v3151_v34  ;;  %2104 = vmatpush1.bf16.msra.mxu1 %v3154_v35  ;;  %v353_v34 = vadd.f32 %v3684_v10, %v131_v26  ;;  %v3220_v35 = vld [vmem:[#allocation8 + $0x720] ss:$16 sps:$4 sm:$0xff]   ;;  %v3229_v10 = vld [vmem:[#allocation8 + $0xe8] ss:$16 sps:$4 sm:$0xff]  }
 0x124   :  { %2064 = vmatprep.subr.bf16.mxu0 %v3159_v36  ;;  %2105 = vmatprep.subr.bf16.mxu1 %v3162_v37  ;;  %v3225_v36 = vld [vmem:[#allocation8 + $0x504] ss:$16 sps:$4 sm:$0xff]   ;;  %v3286_v26 = vld [vmem:[#allocation8 + $0x3c8] ss:$16 sps:$4 sm:$0xff]  }
 0x125   :  { %v3228_v37 = vld [vmem:[#allocation8 + $0x704] ss:$16 sps:$4 sm:$0xff]  }
 0x127   :  { %2065 = vmatpush1.bf16.msra.mxu0 %v3157_v44  ;;  %2106 = vmatpush1.bf16.msra.mxu1 %v3160_v45  ;;  %v406_v44 = vmax.f32 %v394_v31, 0.0  ;;  %v404_v45 = vmax.f32 %v353_v34, 0.0  ;;  %v3292_v31 = vld [vmem:[#allocation8 + $0x3a8] ss:$16 sps:$4 sm:$0xff]   ;;  %v3300_v34 = vld [vmem:[#allocation8 + $0x38c] ss:$16 sps:$4 sm:$0xff]  }
 0x128   :  { %2066 = vmatprep.subr.bf16.mxu0 %v3165_v46  ;;  %2107 = vmatprep.subr.bf16.mxu1 %v3168_v47  ;;  %v3226_v46 = vld [vmem:[#allocation8 + $0x700] ss:$16 sps:$4 sm:$0xff]   ;;  %v3231_v47 = vld [vmem:[#allocation8 + $0xec] ss:$16 sps:$4 sm:$0xff]  }
 0x12b   :  { %2067 = vmatpush1.bf16.msra.mxu0 %v3163_v48  ;;  %2108 = vmatpush1.bf16.msra.mxu1 %v3166_v49  ;;  %v3705_v48 = vpack.c.bf16 %v406_v44, %v406_v44  ;;  %v3707_v49 = vpack.c.bf16 %v404_v45, %v404_v45  ;;  %v3306_v44 = vld [vmem:[#allocation8 + $0x36c] ss:$16 sps:$4 sm:$0xff]   ;;  %v3304_v45 = vld [vmem:[#allocation8 + $0x368] ss:$16 sps:$4 sm:$0xff]  }
 0x12c   :  { %2068 = vmatprep.subr.bf16.mxu0 %v3171_v50  ;;  %2109 = vmatprep.subr.bf16.mxu1 %v3174_v51  ;;  %v3232_v50 = vld [vmem:[#allocation8 + $0x2e8] ss:$16 sps:$4 sm:$0xff]   ;;  %v3237_v51 = vld [vmem:[#allocation8 + $0xcc] ss:$16 sps:$4 sm:$0xff]  }
 0x12f   :  { %2069 = vmatpush1.bf16.msra.mxu0 %v3169_v52  ;;  %2110 = vmatpush1.bf16.msra.mxu1 %v3172_v53  ;;  %v3240_v52 = vld [vmem:[#allocation8 + $0x2cc] ss:$16 sps:$4 sm:$0xff]   ;;  %v3235_v53 = vld [vmem:[#allocation8 + $0xc8] ss:$16 sps:$4 sm:$0xff]  }
 0x130   :  { %2070 = vmatprep.subr.bf16.mxu0 %v3177_v54  ;;  %2111 = vmatprep.subr.bf16.mxu1 %v3180_v55  ;;  %v3238_v54 = vld [vmem:[#allocation8 + $0x2c8] ss:$16 sps:$4 sm:$0xff]   ;;  %v3243_v55 = vld [vmem:[#allocation8 + $0xac] ss:$16 sps:$4 sm:$0xff]  }
 0x133   :  { %2071 = vmatpush1.bf16.msra.mxu0 %v3175_v56  ;;  %2112 = vmatpush1.bf16.msra.mxu1 %v3178_v57  ;;  %v3246_v56 = vld [vmem:[#allocation8 + $0x2ac] ss:$16 sps:$4 sm:$0xff]   ;;  %v3241_v57 = vld [vmem:[#allocation8 + $0xa8] ss:$16 sps:$4 sm:$0xff]  }
 0x134   :  { %2072 = vmatprep.subr.bf16.mxu0 %v3183_v58  ;;  %2113 = vmatprep.subr.bf16.mxu1 %v3186_v59  ;;  %v3244_v58 = vld [vmem:[#allocation8 + $0x2a8] ss:$16 sps:$4 sm:$0xff]   ;;  %v3249_v59 = vld [vmem:[#allocation8 + $0x8c] ss:$16 sps:$4 sm:$0xff]  }
 0x137   :  { %2073 = vmatpush2.bf16.msra.mxu0 %v3181_v60  ;;  %2114 = vmatpush2.bf16.msra.mxu1 %v3184_v61  ;;  %v3252_v60 = vld [vmem:[#allocation8 + $0x28c] ss:$16 sps:$4 sm:$0xff]   ;;  %v3247_v61 = vld [vmem:[#allocation8 + $0x88] ss:$16 sps:$4 sm:$0xff]  }
 0x138   :  { %2074 = vmatprep.subr.bf16.mxu0 %v3189_v62  ;;  %2115 = vmatprep.subr.bf16.mxu1 %v3192_v63  ;;  %v3255_v62 = vld [vmem:[#allocation8 + $0x6c] ss:$16 sps:$4 sm:$0xff]  }
 0x139   :  { %v3258_v63 = vld [vmem:[#allocation8 + $0x26c] ss:$16 sps:$4 sm:$0xff]  }
 0x13b   :  { %2075 = vmatpush2.bf16.msra.mxu0 %v3187_v0  ;;  %2116 = vmatpush2.bf16.msra.mxu1 %v3190_v3  ;;  %v3256_v0 = vld [vmem:[#allocation8 + $0x268] ss:$16 sps:$4 sm:$0xff]   ;;  %v3261_v3 = vld [vmem:[#allocation8 + $0x4c] ss:$16 sps:$4 sm:$0xff]  }
 0x13c   :  { %2076 = vmatprep.subr.bf16.mxu0 %v3195_v4  ;;  %2117 = vmatprep.subr.bf16.mxu1 %v3198_v5  ;;  %v3264_v4 = vld [vmem:[#allocation8 + $0x24c] ss:$16 sps:$4 sm:$0xff]   ;;  %v3259_v5 = vld [vmem:[#allocation8 + $0x48] ss:$16 sps:$4 sm:$0xff]  }
 0x13f   :  { %2077 = vmatpush2.bf16.msra.mxu0 %v3193_v8  ;;  %2118 = vmatpush2.bf16.msra.mxu1 %v3196_v9  ;;  %v3262_v8 = vld [vmem:[#allocation8 + $0x248] ss:$16 sps:$4 sm:$0xff]   ;;  %v3267_v9 = vld [vmem:[#allocation8 + $0x2c] ss:$16 sps:$4 sm:$0xff]  }
 0x140   :  { %2078 = vmatprep.subr.bf16.mxu0 %v3201_v11  ;;  %2119 = vmatprep.subr.bf16.mxu1 %v3204_v12  ;;  %v3270_v11 = vld [vmem:[#allocation8 + $0x22c] ss:$16 sps:$4 sm:$0xff]   ;;  %v3265_v12 = vld [vmem:[#allocation8 + $0x28] ss:$16 sps:$4 sm:$0xff]  }
 0x143   :  { %2079 = vmatpush2.bf16.msra.mxu0 %v3199_v14  ;;  %2120 = vmatpush2.bf16.msra.mxu1 %v3202_v15  ;;  %v3268_v14 = vld [vmem:[#allocation8 + $0x228] ss:$16 sps:$4 sm:$0xff]   ;;  %v3273_v15 = vld [vmem:[#allocation8 + $0xc] ss:$16 sps:$4 sm:$0xff]  }
 0x144   :  { %2080 = vmatprep.subr.bf16.mxu0 %v3207_v16  ;;  %2121 = vmatprep.subr.bf16.mxu1 %v3210_v17  ;;  %v3276_v16 = vld [vmem:[#allocation8 + $0x20c] ss:$16 sps:$4 sm:$0xff]   ;;  %v3271_v17 = vld [vmem:[#allocation8 + $0x8] ss:$16 sps:$4 sm:$0xff]  }
 0x147   :  { %2081 = vmatpush2.bf16.msra.mxu0 %v3205_v18  ;;  %2122 = vmatpush2.bf16.msra.mxu1 %v3208_v20  ;;  %v3274_v18 = vld [vmem:[#allocation8 + $0x208] ss:$16 sps:$4 sm:$0xff]   ;;  %v3282_v20 = vld [vmem:[#allocation8 + $0x3ec] ss:$16 sps:$4 sm:$0xff]  }
 0x148   :  { %2082 = vmatprep.subr.bf16.mxu0 %v3213_v22  ;;  %2123 = vmatprep.subr.bf16.mxu1 %v3216_v23  ;;  %v3280_v22 = vld [vmem:[#allocation8 + $0x3e8] ss:$16 sps:$4 sm:$0xff]   ;;  %v3285_v23 = vld [vmem:[#allocation8 + $0x1cc] ss:$16 sps:$4 sm:$0xff]  }
 0x14b   :  { %2083 = vmatpush2.bf16.msra.mxu0 %v3211_v25  ;;  %2124 = vmatpush2.bf16.msra.mxu1 %v3214_v27  ;;  %v3283_v25 = vld [vmem:[#allocation8 + $0x1c8] ss:$16 sps:$4 sm:$0xff]   ;;  %v3291_v27 = vld [vmem:[#allocation8 + $0x1ac] ss:$16 sps:$4 sm:$0xff]  }
 0x14c   :  { %2084 = vmatprep.subr.bf16.mxu0 %v3219_v29  ;;  %2125 = vmatprep.subr.bf16.mxu1 %v3222_v30  ;;  %v3294_v29 = vld [vmem:[#allocation8 + $0x3ac] ss:$16 sps:$4 sm:$0xff]   ;;  %v3289_v30 = vld [vmem:[#allocation8 + $0x1a8] ss:$16 sps:$4 sm:$0xff]  }
 0x14f   :  { %2085 = vmatpush2.bf16.msra.mxu0 %v3217_v33  ;;  %2126 = vmatpush2.bf16.msra.mxu1 %v3220_v35  ;;  %v3297_v33 = vld [vmem:[#allocation8 + $0x18c] ss:$16 sps:$4 sm:$0xff]   ;;  %v3295_v35 = vld [vmem:[#allocation8 + $0x188] ss:$16 sps:$4 sm:$0xff]  }
 0x150   :  { %2086 = vmatprep.subr.bf16.mxu0 %v3225_v36  ;;  %2127 = vmatprep.subr.bf16.mxu1 %v3228_v37  ;;  %v3298_v36 = vld [vmem:[#allocation8 + $0x388] ss:$16 sps:$4 sm:$0xff]   ;;  %v3303_v37 = vld [vmem:[#allocation8 + $0x16c] ss:$16 sps:$4 sm:$0xff]  }
 0x153   :  { %2087 = vmatpush2.bf16.msra.mxu0 %v3223_v40  ;;  %2128 = vmatpush2.bf16.msra.mxu1 %v3226_v46  ;;  %v3301_v40 = vld [vmem:[#allocation8 + $0x168] ss:$16 sps:$4 sm:$0xff]   ;;  %v3309_v46 = vld [vmem:[#allocation8 + $0x14c] ss:$16 sps:$4 sm:$0xff]  }
 0x154   :  { %2138 = vmatprep.subr.bf16.mxu0 %v3231_v47  ;;  %2179 = vmatprep.subr.bf16.mxu1 %v3234_v13  ;;  %v3312_v47 = vld [vmem:[#allocation8 + $0x34c] ss:$16 sps:$4 sm:$0xff]   ;;  %v3307_v13 = vld [vmem:[#allocation8 + $0x148] ss:$16 sps:$4 sm:$0xff]  }
 0x156   :  { %2089 = vmatmul.mubr.bf16.vlgmr.msra.gmra.mxu0 %v3707_v49  ;;  %2130 = vmatmul.mubr.bf16.vlgmr.msra.gmra.mxu1 %v3705_v48 }
 0x157   :  { %2139 = vmatpush1.bf16.msra.mxu0 %v3229_v10  ;;  %2170 = vmatprep.mubr.bf16.mxu0 %v3677_v2  ;;  %v3250_v2 = vld [vmem:[#allocation8 + $0x288] ss:$16 sps:$4 sm:$0xff]  }
 0x158   :  { %2180 = vmatpush1.bf16.msra.mxu1 %v3232_v50  ;;  %2211 = vmatprep.mubr.bf16.mxu1 %v3682_v7  ;;  %v3253_v7 = vld [vmem:[#allocation8 + $0x68] ss:$16 sps:$4 sm:$0xff]   ;;  %v3315_v50 = vld [vmem:[#allocation8 + $0x12c] ss:$16 sps:$4 sm:$0xff]  }
 0x159   :  { %2140 = vmatprep.subr.bf16.mxu0 %v3237_v51  ;;  %2181 = vmatprep.subr.bf16.mxu1 %v3240_v52  ;;  %v3310_v10 = vld [vmem:[#allocation8 + $0x348] ss:$16 sps:$4 sm:$0xff]   ;;  %v3318_v51 = vld [vmem:[#allocation8 + $0x32c] ss:$16 sps:$4 sm:$0xff]  }
 0x15a   :  { %v3313_v52 = vld [vmem:[#allocation8 + $0x128] ss:$16 sps:$4 sm:$0xff]  }
 0x15b   :  { %2141 = vmatpush1.bf16.msra.mxu0 %v3235_v53  ;;  %v3316_v53 = vld [vmem:[#allocation8 + $0x328] ss:$16 sps:$4 sm:$0xff]  }
 0x15c   :  { %2182 = vmatpush1.bf16.msra.mxu1 %v3238_v54  ;;  %2142 = vmatprep.subr.bf16.mxu0 %v3243_v55  ;;  %v3321_v54 = vld [vmem:[#allocation8 + $0x10c] ss:$16 sps:$4 sm:$0xff]  }
 0x15d   :  { %2183 = vmatprep.subr.bf16.mxu1 %v3246_v56  ;;  %v3324_v55 = vld [vmem:[#allocation8 + $0x30c] ss:$16 sps:$4 sm:$0xff]   ;;  %v3319_v56 = vld [vmem:[#allocation8 + $0x108] ss:$16 sps:$4 sm:$0xff]  }
 0x15f   :  { %2143 = vmatpush1.bf16.msra.mxu0 %v3241_v57  ;;  %v3322_v57 = vld [vmem:[#allocation8 + $0x308] ss:$16 sps:$4 sm:$0xff]  }
 0x160   :  { %2184 = vmatpush1.bf16.msra.mxu1 %v3244_v58  ;;  %2144 = vmatprep.subr.bf16.mxu0 %v3249_v59  ;;  %v3327_v58 = vld [vmem:[#allocation8 + $0x4ec] ss:$16 sps:$4 sm:$0xff]  }
 0x161   :  { %2185 = vmatprep.subr.bf16.mxu1 %v3252_v60  ;;  %v3330_v59 = vld [vmem:[#allocation8 + $0x6ec] ss:$16 sps:$4 sm:$0xff]   ;;  %v3325_v60 = vld [vmem:[#allocation8 + $0x4e8] ss:$16 sps:$4 sm:$0xff]  }
 0x163   :  { %2145 = vmatpush1.bf16.msra.mxu0 %v3247_v61  ;;  %v3328_v61 = vld [vmem:[#allocation8 + $0x6e8] ss:$16 sps:$4 sm:$0xff]  }
 0x164   :  { %2186 = vmatpush1.bf16.msra.mxu1 %v3250_v2  ;;  %2146 = vmatprep.subr.bf16.mxu0 %v3255_v62  ;;  %v3333_v2 = vld [vmem:[#allocation8 + $0x4cc] ss:$16 sps:$4 sm:$0xff]  }
 0x165   :  { %2187 = vmatprep.subr.bf16.mxu1 %v3258_v63  ;;  %v3336_v62 = vld [vmem:[#allocation8 + $0x6cc] ss:$16 sps:$4 sm:$0xff]   ;;  %v3331_v63 = vld [vmem:[#allocation8 + $0x4c8] ss:$16 sps:$4 sm:$0xff]  }
 0x167   :  { %2147 = vmatpush1.bf16.msra.mxu0 %v3253_v7  ;;  %v3334_v7 = vld [vmem:[#allocation8 + $0x6c8] ss:$16 sps:$4 sm:$0xff]  }
 0x168   :  { %2188 = vmatpush1.bf16.msra.mxu1 %v3256_v0  ;;  %2148 = vmatprep.subr.bf16.mxu0 %v3261_v3  ;;  %v3339_v0 = vld [vmem:[#allocation8 + $0x4ac] ss:$16 sps:$4 sm:$0xff]  }
 0x169   :  { %2189 = vmatprep.subr.bf16.mxu1 %v3264_v4  ;;  %v3342_v3 = vld [vmem:[#allocation8 + $0x6ac] ss:$16 sps:$4 sm:$0xff]   ;;  %v3337_v4 = vld [vmem:[#allocation8 + $0x4a8] ss:$16 sps:$4 sm:$0xff]  }
 0x16b   :  { %2149 = vmatpush1.bf16.msra.mxu0 %v3259_v5  ;;  %v3345_v5 = vld [vmem:[#allocation8 + $0x48c] ss:$16 sps:$4 sm:$0xff]  }
 0x16c   :  { %2190 = vmatpush1.bf16.msra.mxu1 %v3262_v8  ;;  %2150 = vmatprep.subr.bf16.mxu0 %v3267_v9  ;;  %v3343_v8 = vld [vmem:[#allocation8 + $0x488] ss:$16 sps:$4 sm:$0xff]   ;;  %v3351_v9 = vld [vmem:[#allocation8 + $0x46c] ss:$16 sps:$4 sm:$0xff]  }
 0x16d   :  { %2191 = vmatprep.subr.bf16.mxu1 %v3270_v11  ;;  %v3354_v11 = vld [vmem:[#allocation8 + $0x66c] ss:$16 sps:$4 sm:$0xff]  }
 0x16f   :  { %2151 = vmatpush1.bf16.msra.mxu0 %v3265_v12  ;;  %v3352_v12 = vld [vmem:[#allocation8 + $0x668] ss:$16 sps:$4 sm:$0xff]  }
 0x170   :  { %2192 = vmatpush1.bf16.msra.mxu1 %v3268_v14  ;;  %2152 = vmatprep.subr.bf16.mxu0 %v3273_v15  ;;  %v3357_v14 = vld [vmem:[#allocation8 + $0x44c] ss:$16 sps:$4 sm:$0xff]  }
 0x171   :  { %2193 = vmatprep.subr.bf16.mxu1 %v3276_v16  ;;  %v3360_v15 = vld [vmem:[#allocation8 + $0x64c] ss:$16 sps:$4 sm:$0xff]   ;;  %v3355_v16 = vld [vmem:[#allocation8 + $0x448] ss:$16 sps:$4 sm:$0xff]  }
 0x173   :  { %2153 = vmatpush1.bf16.msra.mxu0 %v3271_v17  ;;  %v3358_v17 = vld [vmem:[#allocation8 + $0x648] ss:$16 sps:$4 sm:$0xff]  }
 0x174   :  { %2194 = vmatpush1.bf16.msra.mxu1 %v3274_v18  ;;  %2154 = vmatprep.subr.bf16.mxu0 %v3279_v19  ;;  %v3363_v18 = vld [vmem:[#allocation8 + $0x42c] ss:$16 sps:$4 sm:$0xff]  }
 0x175   :  { %2195 = vmatprep.subr.bf16.mxu1 %v3282_v20  ;;  %v3366_v19 = vld [vmem:[#allocation8 + $0x62c] ss:$16 sps:$4 sm:$0xff]   ;;  %v3361_v20 = vld [vmem:[#allocation8 + $0x428] ss:$16 sps:$4 sm:$0xff]  }
 0x177   :  { %2155 = vmatpush2.bf16.msra.mxu0 %v3277_v21  ;;  %v3364_v21 = vld [vmem:[#allocation8 + $0x628] ss:$16 sps:$4 sm:$0xff]  }
 0x178   :  { %2196 = vmatpush2.bf16.msra.mxu1 %v3280_v22  ;;  %2156 = vmatprep.subr.bf16.mxu0 %v3285_v23  ;;  %v3369_v22 = vld [vmem:[#allocation8 + $0x40c] ss:$16 sps:$4 sm:$0xff]  }
 0x179   :  { %2197 = vmatprep.subr.bf16.mxu1 %v3288_v24  ;;  %v3372_v23 = vld [vmem:[#allocation8 + $0x60c] ss:$16 sps:$4 sm:$0xff]   ;;  %v3367_v24 = vld [vmem:[#allocation8 + $0x408] ss:$16 sps:$4 sm:$0xff]  }
 0x17b   :  { %2157 = vmatpush2.bf16.msra.mxu0 %v3283_v25  ;;  %v3370_v25 = vld [vmem:[#allocation8 + $0x608] ss:$16 sps:$4 sm:$0xff]  }
 0x17c   :  { %2198 = vmatpush2.bf16.msra.mxu1 %v3286_v26  ;;  %2158 = vmatprep.subr.bf16.mxu0 %v3291_v27  ;;  %v3375_v26 = vld [vmem:[#allocation8 + $0x5ec] ss:$16 sps:$4 sm:$0xff]  }
 0x17d   :  { %2199 = vmatprep.subr.bf16.mxu1 %v3294_v29  ;;  %v3378_v27 = vld [vmem:[#allocation8 + $0x7ec] ss:$16 sps:$4 sm:$0xff]   ;;  %v3373_v29 = vld [vmem:[#allocation8 + $0x5e8] ss:$16 sps:$4 sm:$0xff]  }
 0x17f   :  { %2159 = vmatpush2.bf16.msra.mxu0 %v3289_v30  ;;  %v3376_v30 = vld [vmem:[#allocation8 + $0x7e8] ss:$16 sps:$4 sm:$0xff]  }
 0x180   :  { %2200 = vmatpush2.bf16.msra.mxu1 %v3292_v31  ;;  %2160 = vmatprep.subr.bf16.mxu0 %v3297_v33  ;;  %v3381_v31 = vld [vmem:[#allocation8 + $0x5cc] ss:$16 sps:$4 sm:$0xff]  }
 0x181   :  { %2201 = vmatprep.subr.bf16.mxu1 %v3300_v34  ;;  %v3384_v33 = vld [vmem:[#allocation8 + $0x7cc] ss:$16 sps:$4 sm:$0xff]   ;;  %v3379_v34 = vld [vmem:[#allocation8 + $0x5c8] ss:$16 sps:$4 sm:$0xff]  }
 0x183   :  { %2161 = vmatpush2.bf16.msra.mxu0 %v3295_v35  ;;  %v3382_v35 = vld [vmem:[#allocation8 + $0x7c8] ss:$16 sps:$4 sm:$0xff]  }
 0x184   :  { %2202 = vmatpush2.bf16.msra.mxu1 %v3298_v36  ;;  %2162 = vmatprep.subr.bf16.mxu0 %v3303_v37  ;;  %v3387_v36 = vld [vmem:[#allocation8 + $0x5ac] ss:$16 sps:$4 sm:$0xff]  }
 0x185   :  { %2203 = vmatprep.subr.bf16.mxu1 %v3306_v44  ;;  %v3390_v37 = vld [vmem:[#allocation8 + $0x7ac] ss:$16 sps:$4 sm:$0xff]   ;;  %v3385_v44 = vld [vmem:[#allocation8 + $0x5a8] ss:$16 sps:$4 sm:$0xff]  }
 0x187   :  { %2163 = vmatpush2.bf16.msra.mxu0 %v3301_v40  ;;  %v3388_v40 = vld [vmem:[#allocation8 + $0x7a8] ss:$16 sps:$4 sm:$0xff]  }
 0x188   :  { %2204 = vmatpush2.bf16.msra.mxu1 %v3304_v45  ;;  %2164 = vmatprep.subr.bf16.mxu0 %v3309_v46  ;;  %v3393_v45 = vld [vmem:[#allocation8 + $0x58c] ss:$16 sps:$4 sm:$0xff]  }
 0x189   :  { %2205 = vmatprep.subr.bf16.mxu1 %v3312_v47  ;;  %v3396_v46 = vld [vmem:[#allocation8 + $0x78c] ss:$16 sps:$4 sm:$0xff]   ;;  %v3391_v47 = vld [vmem:[#allocation8 + $0x588] ss:$16 sps:$4 sm:$0xff]  }
 0x18b   :  { %2165 = vmatpush2.bf16.msra.mxu0 %v3307_v13  ;;  %v3394_v13 = vld [vmem:[#allocation8 + $0x788] ss:$16 sps:$4 sm:$0xff]  }
 0x18c   :  { %2206 = vmatpush2.bf16.msra.mxu1 %v3310_v10  ;;  %2166 = vmatprep.subr.bf16.mxu0 %v3315_v50  ;;  %v3399_v10 = vld [vmem:[#allocation8 + $0x56c] ss:$16 sps:$4 sm:$0xff]  }
 0x18d   :  { %2207 = vmatprep.subr.bf16.mxu1 %v3318_v51  ;;  %v3402_v50 = vld [vmem:[#allocation8 + $0x76c] ss:$16 sps:$4 sm:$0xff]   ;;  %v3397_v51 = vld [vmem:[#allocation8 + $0x568] ss:$16 sps:$4 sm:$0xff]  }
 0x18f   :  { %2167 = vmatpush2.bf16.msra.mxu0 %v3313_v52  ;;  %v3400_v52 = vld [vmem:[#allocation8 + $0x768] ss:$16 sps:$4 sm:$0xff]  }
 0x190   :  { %2208 = vmatpush2.bf16.msra.mxu1 %v3316_v53  ;;  %2168 = vmatprep.subr.bf16.mxu0 %v3321_v54  ;;  %v3405_v53 = vld [vmem:[#allocation8 + $0x54c] ss:$16 sps:$4 sm:$0xff]  }
 0x191   :  { %2209 = vmatprep.subr.bf16.mxu1 %v3324_v55  ;;  %v3408_v54 = vld [vmem:[#allocation8 + $0x74c] ss:$16 sps:$4 sm:$0xff]   ;;  %v3403_v55 = vld [vmem:[#allocation8 + $0x548] ss:$16 sps:$4 sm:$0xff]  }
 0x193   :  { %2169 = vmatpush2.bf16.msra.mxu0 %v3319_v56  ;;  %v3406_v56 = vld [vmem:[#allocation8 + $0x748] ss:$16 sps:$4 sm:$0xff]  }
 0x194   :  { %2210 = vmatpush2.bf16.msra.mxu1 %v3322_v57  ;;  %2220 = vmatprep.subr.bf16.mxu0 %v3327_v58  ;;  %v3411_v57 = vld [vmem:[#allocation8 + $0x52c] ss:$16 sps:$4 sm:$0xff]  }
 0x195   :  { %2261 = vmatprep.subr.bf16.mxu1 %v3330_v59  ;;  %v3414_v58 = vld [vmem:[#allocation8 + $0x72c] ss:$16 sps:$4 sm:$0xff]   ;;  %v3409_v59 = vld [vmem:[#allocation8 + $0x528] ss:$16 sps:$4 sm:$0xff]  }
 0x196   :  { %2171 = vmatmul.mubr.bf16.vlgmr.msra.gmra.mxu0 %v3680_v6  ;;  %v3340_v6 = vld [vmem:[#allocation8 + $0x6a8] ss:$16 sps:$4 sm:$0xff]  }
 0x197   :  { %2212 = vmatmul.mubr.bf16.vlgmr.msra.gmra.mxu1 %v3675_v1  ;;  %2221 = vmatpush1.bf16.msra.mxu0 %v3325_v60  ;;  %v3348_v1 = vld [vmem:[#allocation8 + $0x68c] ss:$16 sps:$4 sm:$0xff]   ;;  %v3412_v60 = vld [vmem:[#allocation8 + $0x728] ss:$16 sps:$4 sm:$0xff]  }
 0x198   :  { %2252 = vmatprep.mubr.bf16.mxu0 %v3693_v28  ;;  %2262 = vmatpush1.bf16.msra.mxu1 %v3328_v61  ;;  %v3346_v28 = vld [vmem:[#allocation8 + $0x688] ss:$16 sps:$4 sm:$0xff]   ;;  %v3417_v61 = vld [vmem:[#allocation8 + $0x50c] ss:$16 sps:$4 sm:$0xff]  }
 0x199   :  { %2293 = vmatprep.mubr.bf16.mxu1 %v3695_v32  ;;  %2222 = vmatprep.subr.bf16.mxu0 %v3333_v2  ;;  %v3349_v32 = vld [vmem:[#allocation8 + $0x468] ss:$16 sps:$4 sm:$0xff]   ;;  %v3420_v2 = vld [vmem:[#allocation8 + $0x70c] ss:$16 sps:$4 sm:$0xff]  }
 0x19a   :  { %2263 = vmatprep.subr.bf16.mxu1 %v3336_v62  ;;  %v3415_v62 = vld [vmem:[#allocation8 + $0x508] ss:$16 sps:$4 sm:$0xff]  }
 0x19b   :  { %2223 = vmatpush1.bf16.msra.mxu0 %v3331_v63  ;;  %v3418_v63 = vld [vmem:[#allocation8 + $0x708] ss:$16 sps:$4 sm:$0xff]  }
 0x19c   :  { %2264 = vmatpush1.bf16.msra.mxu1 %v3334_v7  ;;  %2224 = vmatprep.subr.bf16.mxu0 %v3339_v0  ;;  %v3421_v7 = vld [vmem:[#allocation10 + $0x78] sm:$0xff]  }
 0x19d   :  { %2265 = vmatprep.subr.bf16.mxu1 %v3342_v3  ;;  %v3422_v0 = vld [vmem:[#allocation10 + $0x38] sm:$0xff]   ;;  %v3423_v3 = vld [vmem:[#allocation10 + $0x70] sm:$0xff]  }
 0x19f   :  { %2225 = vmatpush1.bf16.msra.mxu0 %v3337_v4 }
 0x1a0   :  { %2266 = vmatpush1.bf16.msra.mxu1 %v3340_v6  ;;  %2226 = vmatprep.subr.bf16.mxu0 %v3345_v5  ;;  %v3424_v5 = vld [vmem:[#allocation10 + $0x30] sm:$0xff]  }
 0x1a1   :  { %2267 = vmatprep.subr.bf16.mxu1 %v3348_v1 }
 0x1a3   :  { %2227 = vmatpush1.bf16.msra.mxu0 %v3343_v8  ;;  %v3425_v8 = vld [vmem:[#allocation10 + $0x68] sm:$0xff]  }
 0x1a4   :  { %2268 = vmatpush1.bf16.msra.mxu1 %v3346_v28  ;;  %2228 = vmatprep.subr.bf16.mxu0 %v3351_v9 }
 0x1a5   :  { %2269 = vmatprep.subr.bf16.mxu1 %v3354_v11 }
 0x1a7   :  { %2229 = vmatpush1.bf16.msra.mxu0 %v3349_v32  ;;  %v3426_v32 = vld [vmem:[#allocation10 + $0x28] sm:$0xff]  }
 0x1a8   :  { %2270 = vmatpush1.bf16.msra.mxu1 %v3352_v12  ;;  %2230 = vmatprep.subr.bf16.mxu0 %v3357_v14  ;;  %v3427_v14 = vld [vmem:[#allocation10 + $0x60] sm:$0xff]  }
 0x1a9   :  { %2271 = vmatprep.subr.bf16.mxu1 %v3360_v15 }
 0x1ab   :  { %2231 = vmatpush1.bf16.msra.mxu0 %v3355_v16  ;;  %v3437_v16 = vld [vmem:[#allocation10 + $0xf8] sm:$0xff]  }
 0x1ac   :  { %2272 = vmatpush1.bf16.msra.mxu1 %v3358_v17  ;;  %2232 = vmatprep.subr.bf16.mxu0 %v3363_v18  ;;  %v3439_v17 = vld [vmem:[#allocation10 + $0xf0] sm:$0xff]   ;;  %v3429_v18 = vld [vmem:[#allocation10 + $0x58] sm:$0xff]  }
 0x1ad   :  { %2273 = vmatprep.subr.bf16.mxu1 %v3366_v19  ;;  %v3440_v19 = vld [vmem:[#allocation10 + $0xb0] sm:$0xff]  }
 0x1af   :  { %2233 = vmatpush1.bf16.msra.mxu0 %v3361_v20  ;;  %v3441_v20 = vld [vmem:[#allocation10 + $0xe8] sm:$0xff]  }
 0x1b0   :  { %2274 = vmatpush1.bf16.msra.mxu1 %v3364_v21  ;;  %2234 = vmatprep.subr.bf16.mxu0 %v3369_v22  ;;  %v3430_v21 = vld [vmem:[#allocation10 + $0x18] sm:$0xff]   ;;  %v3431_v22 = vld [vmem:[#allocation10 + $0x50] sm:$0xff]  }
 0x1b1   :  { %2275 = vmatprep.subr.bf16.mxu1 %v3372_v23  ;;  %v3442_v23 = vld [vmem:[#allocation10 + $0xa8] sm:$0xff]  }
 0x1b3   :  { %2235 = vmatpush1.bf16.msra.mxu0 %v3367_v24  ;;  %v3443_v24 = vld [vmem:[#allocation10 + $0xe0] sm:$0xff]  }
 0x1b4   :  { %2276 = vmatpush1.bf16.msra.mxu1 %v3370_v25  ;;  %2236 = vmatprep.subr.bf16.mxu0 %v3375_v26  ;;  %v3432_v25 = vld [vmem:[#allocation10 + $0x10] sm:$0xff]   ;;  %v3433_v26 = vld [vmem:[#allocation10 + $0x48] sm:$0xff]  }
 0x1b5   :  { %2277 = vmatprep.subr.bf16.mxu1 %v3378_v27  ;;  %v3444_v27 = vld [vmem:[#allocation10 + $0xa0] sm:$0xff]  }
 0x1b7   :  { %2237 = vmatpush2.bf16.msra.mxu0 %v3373_v29  ;;  %v3445_v29 = vld [vmem:[#allocation10 + $0xd8] sm:$0xff]  }
 0x1b8   :  { %2278 = vmatpush2.bf16.msra.mxu1 %v3376_v30  ;;  %2238 = vmatprep.subr.bf16.mxu0 %v3381_v31  ;;  %v3434_v30 = vld [vmem:[#allocation10 + $0x8] sm:$0xff]   ;;  %v3435_v31 = vld [vmem:[#allocation10 + $0x40] sm:$0xff]  }
 0x1b9   :  { %2279 = vmatprep.subr.bf16.mxu1 %v3384_v33  ;;  %v3446_v33 = vld [vmem:[#allocation10 + $0x98] sm:$0xff]  }
 0x1bb   :  { %2239 = vmatpush2.bf16.msra.mxu0 %v3379_v34  ;;  %v3436_v34 = vld [vmem:[#allocation10] sm:$0xff]  }
 0x1bc   :  { %2280 = vmatpush2.bf16.msra.mxu1 %v3382_v35  ;;  %2240 = vmatprep.subr.bf16.mxu0 %v3387_v36  ;;  %v672_v35 = vld [vmem:[%s3740_s4] sm:$0xf] }
 0x1bd   :  { %2281 = vmatprep.subr.bf16.mxu1 %v3390_v37  ;;  %v677_v36 = vrot.slane %v672_v35, %v114_v39  ;;  %v681_v37 = vrot.slane %v672_v35, %v118_v42  ;;  %v3449_v39 = vld [vmem:[#allocation10 + $0xc8] sm:$0xff]  }
 0x1be   :  { %v3450_v42 = vld [vmem:[#allocation10 + $0x88] sm:$0xff]  }
 0x1bf   :  { %2241 = vmatpush2.bf16.msra.mxu0 %v3385_v44 }
 0x1c0   :  { %2282 = vmatpush2.bf16.msra.mxu1 %v3388_v40  ;;  %2242 = vmatprep.subr.bf16.mxu0 %v3393_v45 }
 0x1c1   :  { %2283 = vmatprep.subr.bf16.mxu1 %v3396_v46 }
 0x1c3   :  { %2243 = vmatpush2.bf16.msra.mxu0 %v3391_v47  ;;  %v3447_v47 = vld [vmem:[#allocation10 + $0xd0] sm:$0xff]  }
 0x1c4   :  { %2284 = vmatpush2.bf16.msra.mxu1 %v3394_v13  ;;  %2244 = vmatprep.subr.bf16.mxu0 %v3399_v10 }
 0x1c5   :  { %2285 = vmatprep.subr.bf16.mxu1 %v3402_v50 }
 0x1c7   :  { %2245 = vmatpush2.bf16.msra.mxu0 %v3397_v51  ;;  %v3448_v51 = vld [vmem:[#allocation10 + $0x90] sm:$0xff]  }
 0x1c8   :  { %2286 = vmatpush2.bf16.msra.mxu1 %v3400_v52  ;;  %2246 = vmatprep.subr.bf16.mxu0 %v3405_v53 }
 0x1c9   :  { %2287 = vmatprep.subr.bf16.mxu1 %v3408_v54 }
 0x1cb   :  { %2247 = vmatpush2.bf16.msra.mxu0 %v3403_v55 }
 0x1cc   :  { %2288 = vmatpush2.bf16.msra.mxu1 %v3406_v56  ;;  %2248 = vmatprep.subr.bf16.mxu0 %v3411_v57 }
 0x1cd   :  { %2289 = vmatprep.subr.bf16.mxu1 %v3414_v58 }
 0x1cf   :  { %2249 = vmatpush2.bf16.msra.mxu0 %v3409_v59 }
 0x1d0   :  { %2290 = vmatpush2.bf16.msra.mxu1 %v3412_v60  ;;  %2250 = vmatprep.subr.bf16.mxu0 %v3417_v61 }
 0x1d1   :  { %2291 = vmatprep.subr.bf16.mxu1 %v3420_v2 }
 0x1d3   :  { %2251 = vmatpush2.bf16.msra.mxu0 %v3415_v62  ;;  %v3451_v62 = vld [vmem:[#allocation10 + $0xc0] sm:$0xff]  }
 0x1d4   :  { %2292 = vmatpush2.bf16.msra.mxu1 %v3418_v63  ;;  %2980 = vmatprep.subr.bf16.mxu0 %v3421_v7  ;;  %v3452_v7 = vld [vmem:[#allocation10 + $0x80] sm:$0xff]  }
 0x1d5   :  { %3002 = vmatprep.subr.bf16.mxu1 %v3437_v16 }
 0x1d6   :  { %2253 = vmatmul.mubr.bf16.vlgmr.msra.gmra.mxu0 %v3707_v49  ;;  %v2008_v4 = vpop.f32.mrf.mxu0  ;;  %v2049_v6 = vpop.f32.mrf.mxu1  ;;  %v3438_v49 = vld [vmem:[#allocation10 + $0xb8] sm:$0xff]  }
 0x1d7   :  { %2294 = vmatmul.mubr.bf16.vlgmr.msra.gmra.mxu1 %v3705_v48  ;;  %2981 = vmatpush3.bf16.msra.mxu0 %v3422_v0  ;;  %v3428_v48 = vld [vmem:[#allocation10 + $0x20] sm:$0xff]   ;;  %v2009_v44 = vadd.f32 %v2008_v4, %v677_v36 }
 0x1d8   :  { %v2010_v1 = vpop.f32.mrf.mxu0  ;;  %2982 = vmatprep.subr.bf16.mxu0 %v3423_v3  ;;  %v2051_v28 = vpop.f32.mrf.mxu1  ;;  %3003 = vmatpush3.bf16.msra.mxu1 %v3438_v49 }
 0x1d9   :  { %3004 = vmatprep.subr.bf16.mxu1 %v3439_v17  ;;  %v2011_v40 = vadd.f32 %v2010_v1, %v681_v37  ;;  %v2050_v45 = vadd.f32 %v2049_v6, %v2009_v44 }
 0x1da   :  { %v2012_v9 = vpop.f32.mrf.mxu0  ;;  %v2053_v11 = vpop.f32.mrf.mxu1 }
 0x1db   :  { %2983 = vmatpush3.bf16.msra.mxu0 %v3424_v5  ;;  %v2052_v13 = vadd.f32 %v2051_v28, %v2011_v40  ;;  %v685_v11 = vrot.slane %v672_v35, %v122_v41 }
 0x1dc   :  { %v2013_v12 = vpop.f32.mrf.mxu0  ;;  %2984 = vmatprep.subr.bf16.mxu0 %v3425_v8  ;;  %v2054_v15 = vpop.f32.mrf.mxu1  ;;  %3005 = vmatpush3.bf16.msra.mxu1 %v3440_v19 }
 0x1dd   :  { %3006 = vmatprep.subr.bf16.mxu1 %v3441_v20 }
 0x1df   :  { %2985 = vmatpush3.bf16.msra.mxu0 %v3426_v32  ;;  %v689_v32 = vrot.slane %v672_v35, %v126_v43  ;;  %v2947_v35 = vld [vmem:[%s3742_s6] ss:$0 sm:$0xff] }
 0x1e0   :  { %2986 = vmatprep.subr.bf16.mxu0 %v3427_v14  ;;  %3007 = vmatpush3.bf16.msra.mxu1 %v3442_v23 }
 0x1e1   :  { %3008 = vmatprep.subr.bf16.mxu1 %v3443_v24 }
 0x1e3   :  { %2987 = vmatpush3.bf16.msra.mxu0 %v3428_v48 }
 0x1e4   :  { %2988 = vmatprep.subr.bf16.mxu0 %v3429_v18  ;;  %3009 = vmatpush3.bf16.msra.mxu1 %v3444_v27 }
 0x1e5   :  { %3010 = vmatprep.subr.bf16.mxu1 %v3445_v29 }
 0x1e7   :  { %2989 = vmatpush3.bf16.msra.mxu0 %v3430_v21 }
 0x1e8   :  { %2990 = vmatprep.subr.bf16.mxu0 %v3431_v22  ;;  %3011 = vmatpush3.bf16.msra.mxu1 %v3446_v33 }
 0x1e9   :  { %3012 = vmatprep.subr.bf16.mxu1 %v3447_v47 }
 0x1eb   :  { %2991 = vmatpush3.bf16.msra.mxu0 %v3432_v25 }
 0x1ec   :  { %2992 = vmatprep.subr.bf16.mxu0 %v3433_v26  ;;  %3013 = vmatpush3.bf16.msra.mxu1 %v3448_v51 }
 0x1ed   :  { %3014 = vmatprep.subr.bf16.mxu1 %v3449_v39 }
 0x1ef   :  { %2993 = vmatpush3.bf16.msra.mxu0 %v3434_v30 }
 0x1f0   :  { %2994 = vmatprep.subr.bf16.mxu0 %v3435_v31  ;;  %3015 = vmatpush3.bf16.msra.mxu1 %v3450_v42 }
 0x1f1   :  { %3016 = vmatprep.subr.bf16.mxu1 %v3451_v62 }
 0x1f3   :  { %2995 = vmatpush3.bf16.msra.mxu0 %v3436_v34 }
 0x1f4   :  { %3017 = vmatpush3.bf16.msra.mxu1 %v3452_v7 }
 0x216   :  { %v2090_v46 = vpop.f32.mrf.mxu0  ;;  %v2131_v50 = vpop.f32.mrf.mxu1 }
 0x217   :  { %v2091_v10 = vadd.f32 %v2090_v46, %v2050_v45 }
 0x218   :  { %v2092_v52 = vpop.f32.mrf.mxu0  ;;  %v2133_v55 = vpop.f32.mrf.mxu1 }
 0x219   :  { %v2132_v53 = vadd.f32 %v2131_v50, %v2091_v10  ;;  %v2093_v54 = vadd.f32 %v2092_v52, %v2052_v13 }
 0x21a   :  { %v2094_v56 = vpop.f32.mrf.mxu0  ;;  %v2135_v58 = vpop.f32.mrf.mxu1 }
 0x21b   :  { %v2134_v57 = vadd.f32 %v2133_v55, %v2093_v54  ;;  %v2302_v59 = vmax.f32 %v2132_v53, 0.0 }
 0x21c   :  { %v2095_v60 = vpop.f32.mrf.mxu0  ;;  %v2136_v2 = vpop.f32.mrf.mxu1 }
 0x21d   :  { %v2303_v61 = vmax.f32 %v2134_v57, 0.0  ;;  %v2306_v0 = vpack.c.bf16 %v2302_v59, %v2302_v59 }
 0x21f   :  { %v2307_v63 = vpack.c.bf16 %v2303_v61, %v2303_v61 }
 0x221   :  { %2605 = vmatprep.mubr.bf16.mxu0 %v2307_v63 }
 0x222   :  { %2606 = vmatmul.mubr.bf16.vlgmr.msra.gmra.mxu0 %v2306_v0 }
 0x256   :  { %v2172_v3 = vpop.f32.mrf.mxu0 }
 0x257   :  { %v2213_v4 = vpop.f32.mrf.mxu1  ;;  %v2173_v12 = vadd.f32 %v2172_v3, %v685_v11 }
 0x258   :  { %v2174_v6 = vpop.f32.mrf.mxu0 }
 0x259   :  { %v2215_v5 = vpop.f32.mrf.mxu1  ;;  %v2175_v14 = vadd.f32 %v2174_v6, %v689_v32  ;;  %v2214_v15 = vadd.f32 %v2213_v4, %v2173_v12 }
 0x25a   :  { %v2176_v1 = vpop.f32.mrf.mxu0 }
 0x25b   :  { %v2217_v8 = vpop.f32.mrf.mxu1  ;;  %v2216_v49 = vadd.f32 %v2215_v5, %v2175_v14 }
 0x25c   :  { %v2177_v28 = vpop.f32.mrf.mxu0 }
 0x25d   :  { %v2218_v9 = vpop.f32.mrf.mxu1 }
 0x296   :  { %v2254_v16 = vpop.f32.mrf.mxu0 }
 0x297   :  { %v2255_v17 = vadd.f32 %v2254_v16, %v2214_v15  ;;  %v2295_v48 = vpop.f32.mrf.mxu1 }
 0x298   :  { %v2256_v18 = vpop.f32.mrf.mxu0 }
 0x299   :  { %v2296_v19 = vadd.f32 %v2295_v48, %v2255_v17  ;;  %v2257_v20 = vadd.f32 %v2256_v18, %v2216_v49  ;;  %v2297_v21 = vpop.f32.mrf.mxu1 }
 0x29a   :  { %v2258_v22 = vpop.f32.mrf.mxu0 }
 0x29b   :  { %v2298_v23 = vadd.f32 %v2297_v21, %v2257_v20  ;;  %v2299_v24 = vpop.f32.mrf.mxu1  ;;  %v2304_v25 = vmax.f32 %v2296_v19, 0.0 }
 0x29c   :  { %v2259_v26 = vpop.f32.mrf.mxu0 }
 0x29d   :  { %v2305_v41 = vmax.f32 %v2298_v23, 0.0  ;;  %v2300_v27 = vpop.f32.mrf.mxu1  ;;  %v2308_v43 = vpack.c.bf16 %v2304_v25, %v2304_v25 }
 0x29f   :  { %v2309_v38 = vpack.c.bf16 %v2305_v41, %v2305_v41 }
 0x2a1   :  { %2645 = vmatprep.mubr.bf16.mxu1 %v2309_v38 }
 0x2a2   :  { %2646 = vmatmul.mubr.bf16.vlgmr.msra.gmra.mxu1 %v2308_v43 }
 0x2e2   :  { %v2996_v29 = vpop.f32.mrf.mxu0 }
 0x2e4   :  { %v2997_v30 = vpop.f32.mrf.mxu0 }
 0x2e5   :  { %v2998_v31 = vadd.f32 %v2997_v30, %v2996_v29 }
 0x2e6   :  { %v2999_v33 = vpop.f32.mrf.mxu0 }
 0x2e7   :  { %v2608_v44 = vadd.f32 %v2998_v31, %v2947_v35 }
 0x2e8   :  { %v3000_v34 = vpop.f32.mrf.mxu0 }
 0x362   :  { %v3018_v36 = vpop.f32.mrf.mxu1 }
 0x364   :  { %v3019_v37 = vpop.f32.mrf.mxu1 }
 0x365   :  { %v3020_v40 = vadd.f32 %v3019_v37, %v3018_v36 }
 0x366   :  { %v3021_v45 = vpop.f32.mrf.mxu1 }
 0x367   :  { %v2648_v46 = vadd.f32 %v3020_v40, %v2608_v44 }
 0x368   :  { %v3022_v47 = vpop.f32.mrf.mxu1 }
 0x369   :  { %2653 = vst [vmem:[#allocation11] sm:$0xff] %v2648_v46 }
 0x36a   :  { %3564 = shalt.err (!%p3561_p1)
}
 0x36b   :  { %2663 = dma.vmem_to_hbm [thread:$0]  %s2661_s8, 128, %s3743_s7, [#allocation4]  }
 0x36c   :  { %3579 = dma.done.wait [#allocation4], 128  }
 0x36d   :  { %3580 = vsyncadd [#allocation4], 4294967168 }
 0x36e   :  { %2667 = vsyncpa [#allocation3], 1 }
 0x36f   :  { %2668 = vsyncpa [#allocation6], 1 }
 0x370   :  { %2669 = vsyncpa [#allocation9], 1 }
 0x371   :  { %2670 = vsyncpa [#allocation4], 1 }

</bundles_post_ra>
